<compile_context>
chip_gen: v5e
topology: v5e:2x2
jax: 0.10.0
libtpu: 0.0.40
codegen_flags: <defaults>
</compile_context>

<pallas_src>
import math
from functools import partial

import jax
import jax.numpy as jnp
from jax import lax
from jax.experimental import pallas as pl
from jax.experimental.pallas import tpu as pltpu


_POOL_CHUNK = 256   # lane width of each pooling matmul chunk


def _round_up(a, m):
    return -(-a // m) * m


def _pick_bt(batch):
    """Batch-tile size: large tiles amortize per-step overhead and make every
    matmul lane-dense, while keeping >= 2 grid steps when the batch allows."""
    for bt in (32, 16, 8):
        if batch >= 2 * bt:
            return bt
    return batch if batch < 8 else 8


def _geometry(L, bt):
    """Static layout.  Per-layer segment strides halve with depth so pooling
    the whole lane axis directly produces the next layer's packed layout."""
    assert L % 16 == 0 and L >= 16, "sequence length must be a multiple of 16"
    s3 = _round_up(L // 8 + 3, 8)            # layer-4 input stride (>= L/8 + pad)
    s = [8 * s3, 4 * s3, 2 * s3, s3]         # per-layer input segment stride
    l = [L, L // 2, L // 4, L // 8]          # per-layer input length
    n = [bt * v for v in s]                  # per-layer conv output width
    m0 = 8                                   # left margin of layer-1 buffer (>= p=7)
    w0 = _round_up(m0 + n[0] + 8, 128)       # layer-1 buffer width (right margin >= 7)
    return dict(s=s, l=l, n=n, m0=m0, w0=w0, lz=L // 16, s3h=s3 // 2, bt=bt)


# ----------------------------------------------------------------------------
# kernel helpers
# ----------------------------------------------------------------------------
def _avgpool2(y, pm):
    """AvgPool1d(2) along lanes of the whole batch-tile row: chunked matmuls
    with a fixed (256, 128) pairwise-average matrix."""
    width = y.shape[1]
    pieces = []
    for q in range(0, width, _POOL_CHUNK):
        c = min(_POOL_CHUNK, width - q)
        pieces.append(jnp.dot(y[:, q:q + c], pm[:c, :c // 2],
                              preferred_element_type=jnp.float32))
    return pieces[0] if len(pieces) == 1 else jnp.concatenate(pieces, axis=1)


def _mask(y, m_ref):
    """Re-zero inter-segment gap lanes (they act as the next conv's zero pad)."""
    return jnp.where(m_ref[...] > 0.5, y, 0.0)


def _embedding_kernel(geo, x0_ref, w1, b1, w2, b2, w3, b3, w4, b4,
                      pool_ref, m1_ref, m2_ref, m3_ref, o_ref):
    n, bt = geo["n"], geo["bt"]
    pm = pool_ref[...]                                        # (256, 128) resident

    # ---- layer 1 (Cin=1, ks=15): im2col straight from the padded input block
    x0 = x0_ref[0]                                            # (1, W0)
    off = geo["m0"] - 7                                       # left margin - pad
    rhs = jnp.concatenate([x0[:, off + k: off + k + n[0]] for k in range(15)],
                          axis=0)                             # (15, n0)
    y = jnp.maximum(jnp.dot(w1[...], rhs, preferred_element_type=jnp.float32)
                    + b1[...], 0.0)                           # (32, n0)
    y = _mask(_avgpool2(y, pm), m1_ref)                       # (32, n1)

    # ---- layers 2..4 (Cin=32, ks=7): im2col on the in-VMEM value ------------
    for w_r, b_r, m_r, width in ((w2, b2, m2_ref, n[1]),
                                 (w3, b3, m3_ref, n[2]),
                                 (w4, b4, None, n[3])):
        zp = jnp.zeros((y.shape[0], 3), jnp.float32)
        hp = jnp.concatenate([zp, y, zp], axis=1)             # 'same' zero pad
        rhs = jnp.concatenate([hp[:, k:k + width] for k in range(7)], axis=0)
        y = jnp.maximum(jnp.dot(w_r[...], rhs, preferred_element_type=jnp.float32)
                        + b_r[...], 0.0)                      # (Cout, width)
        y = _avgpool2(y, pm)                                  # (Cout, width // 2)
        if m_r is not None:
            y = _mask(y, m_r)

    # ---- gather each segment's valid lanes into one lane-dense output slab --
    lz, s3h = geo["lz"], geo["s3h"]
    segs = [y[:, b * s3h: b * s3h + lz] for b in range(bt)]
    o_ref[0] = segs[0] if bt == 1 else jnp.concatenate(segs, axis=1)


# ----------------------------------------------------------------------------
# wrapper
# ----------------------------------------------------------------------------
@jax.jit
def embedding_forward(x, params):
    """x: (B, L) float32  ->  flattened embedding (B, z_dim * L // 16)."""
    B, L = x.shape
    bt = _pick_bt(B)
    geo = _geometry(L, bt)
    cz = params[-1][0].shape[0]
    lz = geo["lz"]
    nsteps = -(-B // bt)
    bp = nsteps * bt

    # ---- layer-1 input buffer: BT zero-gapped segments along lanes ----------
    s0, m0, w0 = geo["s"][0], geo["m0"], geo["w0"]
    xb = jnp.pad(x.astype(jnp.float32), ((0, bp - B), (0, 0))).reshape(nsteps, bt, L)
    seg = jnp.zeros((nsteps, bt, s0), jnp.float32).at[:, :, :L].set(xb)
    x0 = jnp.zeros((nsteps, 1, w0), jnp.float32)
    x0 = x0.at[:, 0, m0:m0 + bt * s0].set(seg.reshape(nsteps, bt * s0))

    # ---- static operands: pooling matrix + gap-validity masks ---------------
    rows = jnp.arange(_POOL_CHUNK)[:, None] // 2
    cols = jnp.arange(_POOL_CHUNK // 2)[None, :]
    pool_mat = jnp.where(rows == cols, 0.5, 0.0).astype(jnp.float32)

    def seg_mask(width, stride, valid):
        return (jnp.arange(width) % stride < valid).astype(jnp.float32).reshape(1, width)

    masks = [seg_mask(geo["n"][i + 1], geo["s"][i + 1], geo["l"][i + 1])
             for i in range(3)]

    args = [x0]
    in_specs = [pl.BlockSpec((1, 1, w0), lambda s: (s, 0, 0))]
    for w2d, b in params:
        args += [w2d, b]
        in_specs += [pl.BlockSpec(w2d.shape, lambda s: (0, 0)),
                     pl.BlockSpec(b.shape, lambda s: (0, 0))]
    args.append(pool_mat)
    in_specs.append(pl.BlockSpec(pool_mat.shape, lambda s: (0, 0)))
    for m in masks:
        args.append(m)
        in_specs.append(pl.BlockSpec(m.shape, lambda s: (0, 0)))

    # ---- advisory cost estimate ---------------------------------------------
    s_ = geo["s"]
    conv_macs = bt * (32 * 15 * s_[0] + 32 * 7 * 32 * s_[1]
                      + 32 * 7 * 32 * s_[2] + cz * 7 * 32 * s_[3])
    pool_macs = bt * 128 * (32 * s_[0] + 32 * s_[1] + 32 * s_[2] + cz * s_[3])
    io_bytes = 4 * (nsteps * (w0 + cz * bt * lz)
                    + sum(int(a.size) for w2d, b in params for a in (w2d, b))
                    + int(pool_mat.size) + sum(int(m.size) for m in masks))
    cost = pl.CostEstimate(flops=int(2 * (conv_macs + pool_macs) * nsteps),
                           transcendentals=0, bytes_accessed=int(io_bytes))

    out = pl.pallas_call(
        partial(_embedding_kernel, geo),
        out_shape=jax.ShapeDtypeStruct((nsteps, cz, bt * lz), jnp.float32),
        grid=(nsteps,),
        in_specs=in_specs,
        out_specs=pl.BlockSpec((1, cz, bt * lz), lambda s: (s, 0, 0)),
        compiler_params=pltpu.CompilerParams(
            dimension_semantics=("parallel",),
            vmem_limit_bytes=64 * 1024 * 1024),
        cost_estimate=cost,
    )(*args)

    # (nsteps, cz, BT*lz) -> (B, cz*lz)   (== torch.flatten(out, 1))
    out = out.reshape(nsteps, cz, bt, lz).transpose(0, 2, 1, 3).reshape(bp, cz * lz)
    return out[:B]


# ----------------------------------------------------------------------------
# parameters (eval-mode BatchNorm folded into the conv weights / bias)
# ----------------------------------------------------------------------------
def init_params(key, in_dim=1, hid_dim=32, z_dim=8, eps=1e-5):
    layer_defs = [(in_dim, hid_dim, 15), (hid_dim, hid_dim, 7),
                  (hid_dim, hid_dim, 7), (hid_dim, z_dim, 7)]
    params = []
    for (cin, cout, ks) in layer_defs:
        key, kw, kb, kg, kbeta = jax.random.split(key, 5)
        bound = 1.0 / math.sqrt(cin * ks)
        w = jax.random.uniform(kw, (cout, cin, ks), jnp.float32, -bound, bound)
        conv_b = jax.random.uniform(kb, (cout,), jnp.float32, -bound, bound)
        gamma = 1.0 + 0.1 * jax.random.normal(kg, (cout,), jnp.float32)
        beta = 0.1 * jax.random.normal(kbeta, (cout,), jnp.float32)
        running_mean = jnp.zeros((cout,), jnp.float32)
        running_var = jnp.ones((cout,), jnp.float32)
        scale = gamma / jnp.sqrt(running_var + eps)          # eval-mode BN
        bias = beta + (conv_b - running_mean) * scale
        w_folded = w * scale[:, None, None]                  # (cout, cin, ks)
        # im2col weight layout: contraction index = k * cin + cin_idx
        w2d = jnp.transpose(w_folded, (0, 2, 1)).reshape(cout, ks * cin)
        params.append((w2d, bias.reshape(cout, 1)))
    return params, layer_defs


# ----------------------------------------------------------------------------
# plain-JAX reference (lax.conv at HIGHEST precision) for validation
# ----------------------------------------------------------------------------
def _reference_forward(x, params, layer_defs):
    h = x.astype(jnp.float32)[:, None, :]
    for (cin, cout, ks), (w2d, bias) in zip(layer_defs, params):
        w = jnp.transpose(w2d.reshape(cout, ks, cin), (0, 2, 1))   # (cout, cin, ks)
        p = ks // 2
        y = lax.conv_general_dilated(
            h, w, window_strides=(1,), padding=[(p, p)],
            dimension_numbers=("NCH", "OIH", "NCH"),
            precision=lax.Precision.HIGHEST)
        y = jnp.maximum(y + bias[None, :, :], 0.0)
        b_, c_, l_ = y.shape
        h = y.reshape(b_, c_, l_ // 2, 2).mean(axis=-1)
    return h.reshape(x.shape[0], -1)


if __name__ == "__main__":
    key = jax.random.PRNGKey(0)
    pkey, xkey = jax.random.split(key)

    # small shapes: batch=2, sequence length=128 (must be a multiple of 16)
    B, L = 2, 128
    params, layer_defs = init_params(pkey)
    x = jax.random.normal(xkey, (B, L), jnp.float32)

    out = jax.block_until_ready(embedding_forward(x, params))
    assert out.shape == (B, 8 * (L // 16)), out.shape      # (2, 64)

    ref = jax.block_until_ready(_reference_forward(x, params, layer_defs))
    err = float(jnp.max(jnp.abs(out - ref)))
    # tolerance covers possible reduced-precision (bf16-pass) MXU accumulation
    assert jnp.allclose(out, ref, atol=2e-2, rtol=2e-2), f"max abs err = {err}"
    print("KERNEL_OK")
</pallas_src>

<mosaic_0001>
module attributes {stable_mosaic.version = 11 : i64} {
  func.func @_embedding_kernel(%arg0: i32, %arg1: memref<1x1x512xf32, #tpu.memory_space<vmem>>, %arg2: memref<32x15xf32, #tpu.memory_space<vmem>>, %arg3: memref<32x1xf32, #tpu.memory_space<vmem>>, %arg4: memref<32x224xf32, #tpu.memory_space<vmem>>, %arg5: memref<32x1xf32, #tpu.memory_space<vmem>>, %arg6: memref<32x224xf32, #tpu.memory_space<vmem>>, %arg7: memref<32x1xf32, #tpu.memory_space<vmem>>, %arg8: memref<8x224xf32, #tpu.memory_space<vmem>>, %arg9: memref<8x1xf32, #tpu.memory_space<vmem>>, %arg10: memref<256x128xf32, #tpu.memory_space<vmem>>, %arg11: memref<1x192xf32, #tpu.memory_space<vmem>>, %arg12: memref<1x96xf32, #tpu.memory_space<vmem>>, %arg13: memref<1x48xf32, #tpu.memory_space<vmem>>, %arg14: memref<1x8x16xf32, #tpu.memory_space<vmem>>) attributes {dimension_semantics = [#tpu.dimension_semantics<parallel>], iteration_bounds = array<i64: 1>, scalar_prefetch = 0 : i64, scratch_operands = 0 : i64, tpu.core_type = #tpu.core_type<tc>, window_params = [{transform_indices = @transform_0, window_bounds = array<i64: 1, 1, 512>}, {pipeline_mode = #tpu.pipeline_mode<synchronous>, transform_indices = @transform_1, window_bounds = array<i64: 32, 15>}, {pipeline_mode = #tpu.pipeline_mode<synchronous>, transform_indices = @transform_2, window_bounds = array<i64: 32, 1>}, {pipeline_mode = #tpu.pipeline_mode<synchronous>, transform_indices = @transform_3, window_bounds = array<i64: 32, 224>}, {pipeline_mode = #tpu.pipeline_mode<synchronous>, transform_indices = @transform_4, window_bounds = array<i64: 32, 1>}, {pipeline_mode = #tpu.pipeline_mode<synchronous>, transform_indices = @transform_5, window_bounds = array<i64: 32, 224>}, {pipeline_mode = #tpu.pipeline_mode<synchronous>, transform_indices = @transform_6, window_bounds = array<i64: 32, 1>}, {pipeline_mode = #tpu.pipeline_mode<synchronous>, transform_indices = @transform_7, window_bounds = array<i64: 8, 224>}, {pipeline_mode = #tpu.pipeline_mode<synchronous>, transform_indices = @transform_8, window_bounds = array<i64: 8, 1>}, {pipeline_mode = #tpu.pipeline_mode<synchronous>, transform_indices = @transform_9, window_bounds = array<i64: 256, 128>}, {pipeline_mode = #tpu.pipeline_mode<synchronous>, transform_indices = @transform_10, window_bounds = array<i64: 1, 192>}, {pipeline_mode = #tpu.pipeline_mode<synchronous>, transform_indices = @transform_11, window_bounds = array<i64: 1, 96>}, {pipeline_mode = #tpu.pipeline_mode<synchronous>, transform_indices = @transform_12, window_bounds = array<i64: 1, 48>}, {transform_indices = @transform_13, window_bounds = array<i64: 1, 8, 16>}]} {
    %c0 = arith.constant 0 : index
    %c0_0 = arith.constant 0 : index
    %0 = vector.load %arg10[%c0, %c0_0] : memref<256x128xf32, #tpu.memory_space<vmem>>, vector<256x128xf32>
    %c0_1 = arith.constant 0 : index
    %c0_2 = arith.constant 0 : index
    %c0_3 = arith.constant 0 : index
    %1 = vector.load %arg1[%c0_1, %c0_2, %c0_3] : memref<1x1x512xf32, #tpu.memory_space<vmem>>, vector<1x1x512xf32>
    %2 = vector.shape_cast %1 : vector<1x1x512xf32> to vector<1x512xf32>
    %3 = vector.extract_strided_slice %2 {offsets = [0, 1], sizes = [1, 384], strides = [1, 1]} : vector<1x512xf32> to vector<1x384xf32>
    %4 = vector.extract_strided_slice %2 {offsets = [0, 2], sizes = [1, 384], strides = [1, 1]} : vector<1x512xf32> to vector<1x384xf32>
    %5 = vector.extract_strided_slice %2 {offsets = [0, 3], sizes = [1, 384], strides = [1, 1]} : vector<1x512xf32> to vector<1x384xf32>
    %6 = vector.extract_strided_slice %2 {offsets = [0, 4], sizes = [1, 384], strides = [1, 1]} : vector<1x512xf32> to vector<1x384xf32>
    %7 = vector.extract_strided_slice %2 {offsets = [0, 5], sizes = [1, 384], strides = [1, 1]} : vector<1x512xf32> to vector<1x384xf32>
    %8 = vector.extract_strided_slice %2 {offsets = [0, 6], sizes = [1, 384], strides = [1, 1]} : vector<1x512xf32> to vector<1x384xf32>
    %9 = vector.extract_strided_slice %2 {offsets = [0, 7], sizes = [1, 384], strides = [1, 1]} : vector<1x512xf32> to vector<1x384xf32>
    %10 = vector.extract_strided_slice %2 {offsets = [0, 8], sizes = [1, 384], strides = [1, 1]} : vector<1x512xf32> to vector<1x384xf32>
    %11 = vector.extract_strided_slice %2 {offsets = [0, 9], sizes = [1, 384], strides = [1, 1]} : vector<1x512xf32> to vector<1x384xf32>
    %12 = vector.extract_strided_slice %2 {offsets = [0, 10], sizes = [1, 384], strides = [1, 1]} : vector<1x512xf32> to vector<1x384xf32>
    %13 = vector.extract_strided_slice %2 {offsets = [0, 11], sizes = [1, 384], strides = [1, 1]} : vector<1x512xf32> to vector<1x384xf32>
    %14 = vector.extract_strided_slice %2 {offsets = [0, 12], sizes = [1, 384], strides = [1, 1]} : vector<1x512xf32> to vector<1x384xf32>
    %15 = vector.extract_strided_slice %2 {offsets = [0, 13], sizes = [1, 384], strides = [1, 1]} : vector<1x512xf32> to vector<1x384xf32>
    %16 = vector.extract_strided_slice %2 {offsets = [0, 14], sizes = [1, 384], strides = [1, 1]} : vector<1x512xf32> to vector<1x384xf32>
    %17 = vector.extract_strided_slice %2 {offsets = [0, 15], sizes = [1, 384], strides = [1, 1]} : vector<1x512xf32> to vector<1x384xf32>
    %18 = tpu.concatenate %3, %4, %5, %6, %7, %8, %9, %10, %11, %12, %13, %14, %15, %16, %17 in 0 : vector<1x384xf32>, vector<1x384xf32>, vector<1x384xf32>, vector<1x384xf32>, vector<1x384xf32>, vector<1x384xf32>, vector<1x384xf32>, vector<1x384xf32>, vector<1x384xf32>, vector<1x384xf32>, vector<1x384xf32>, vector<1x384xf32>, vector<1x384xf32>, vector<1x384xf32>, vector<1x384xf32> -> vector<15x384xf32>
    %c0_4 = arith.constant 0 : index
    %c0_5 = arith.constant 0 : index
    %19 = vector.load %arg2[%c0_4, %c0_5] : memref<32x15xf32, #tpu.memory_space<vmem>>, vector<32x15xf32>
    %cst = arith.constant dense<0.000000e+00> : vector<32x384xf32>
    %20 = tpu.matmul %19, %18, %cst {dimension_numbers = #tpu.dot_dimension_numbers<[1], [0], [0], [1], [0, 0, 1, 1], [], []>} : vector<32x15xf32>, vector<15x384xf32>, vector<32x384xf32> -> vector<32x384xf32>
    %c0_6 = arith.constant 0 : index
    %c0_7 = arith.constant 0 : index
    %21 = vector.load %arg3[%c0_6, %c0_7] : memref<32x1xf32, #tpu.memory_space<vmem>>, vector<32x1xf32>
    %22 = vector.broadcast %21 : vector<32x1xf32> to vector<32x384xf32>
    %23 = arith.addf %20, %22 : vector<32x384xf32>
    %cst_8 = arith.constant 0.000000e+00 : f32
    %24 = vector.broadcast %cst_8 : f32 to vector<32x384xf32>
    %25 = arith.maximumf %23, %24 : vector<32x384xf32>
    %26 = vector.extract_strided_slice %25 {offsets = [0, 0], sizes = [32, 256], strides = [1, 1]} : vector<32x384xf32> to vector<32x256xf32>
    %cst_9 = arith.constant dense<0.000000e+00> : vector<32x128xf32>
    %27 = tpu.matmul %26, %0, %cst_9 {dimension_numbers = #tpu.dot_dimension_numbers<[1], [0], [0], [1], [0, 0, 1, 1], [], []>} : vector<32x256xf32>, vector<256x128xf32>, vector<32x128xf32> -> vector<32x128xf32>
    %28 = vector.extract_strided_slice %25 {offsets = [0, 256], sizes = [32, 128], strides = [1, 1]} : vector<32x384xf32> to vector<32x128xf32>
    %29 = vector.extract_strided_slice %0 {offsets = [0, 0], sizes = [128, 64], strides = [1, 1]} : vector<256x128xf32> to vector<128x64xf32>
    %cst_10 = arith.constant dense<0.000000e+00> : vector<32x64xf32>
    %30 = tpu.matmul %28, %29, %cst_10 {dimension_numbers = #tpu.dot_dimension_numbers<[1], [0], [0], [1], [0, 0, 1, 1], [], []>} : vector<32x128xf32>, vector<128x64xf32>, vector<32x64xf32> -> vector<32x64xf32>
    %31 = tpu.concatenate %27, %30 in 1 : vector<32x128xf32>, vector<32x64xf32> -> vector<32x192xf32>
    %c0_11 = arith.constant 0 : index
    %c0_12 = arith.constant 0 : index
    %32 = vector.load %arg11[%c0_11, %c0_12] : memref<1x192xf32, #tpu.memory_space<vmem>>, vector<1x192xf32>
    %cst_13 = arith.constant 5.000000e-01 : f32
    %33 = vector.broadcast %cst_13 : f32 to vector<1x192xf32>
    %34 = arith.cmpf ogt, %32, %33 : vector<1x192xf32>
    %cst_14 = arith.constant 0.000000e+00 : f32
    %35 = vector.shape_cast %34 : vector<1x192xi1> to vector<1x192xi1>
    %36 = vector.broadcast %35 : vector<1x192xi1> to vector<32x192xi1>
    %37 = vector.broadcast %cst_14 : f32 to vector<32x192xf32>
    %38 = arith.select %36, %31, %37 : vector<32x192xi1>, vector<32x192xf32>
    %cst_15 = arith.constant 0.000000e+00 : f32
    %39 = vector.broadcast %cst_15 : f32 to vector<32x3xf32>
    %40 = tpu.concatenate %39, %38, %39 in 1 : vector<32x3xf32>, vector<32x192xf32>, vector<32x3xf32> -> vector<32x198xf32>
    %41 = vector.extract_strided_slice %40 {offsets = [0, 0], sizes = [32, 192], strides = [1, 1]} : vector<32x198xf32> to vector<32x192xf32>
    %42 = vector.extract_strided_slice %40 {offsets = [0, 1], sizes = [32, 192], strides = [1, 1]} : vector<32x198xf32> to vector<32x192xf32>
    %43 = vector.extract_strided_slice %40 {offsets = [0, 2], sizes = [32, 192], strides = [1, 1]} : vector<32x198xf32> to vector<32x192xf32>
    %44 = vector.extract_strided_slice %40 {offsets = [0, 3], sizes = [32, 192], strides = [1, 1]} : vector<32x198xf32> to vector<32x192xf32>
    %45 = vector.extract_strided_slice %40 {offsets = [0, 4], sizes = [32, 192], strides = [1, 1]} : vector<32x198xf32> to vector<32x192xf32>
    %46 = vector.extract_strided_slice %40 {offsets = [0, 5], sizes = [32, 192], strides = [1, 1]} : vector<32x198xf32> to vector<32x192xf32>
    %47 = vector.extract_strided_slice %40 {offsets = [0, 6], sizes = [32, 192], strides = [1, 1]} : vector<32x198xf32> to vector<32x192xf32>
    %48 = tpu.concatenate %41, %42, %43, %44, %45, %46, %47 in 0 : vector<32x192xf32>, vector<32x192xf32>, vector<32x192xf32>, vector<32x192xf32>, vector<32x192xf32>, vector<32x192xf32>, vector<32x192xf32> -> vector<224x192xf32>
    %c0_16 = arith.constant 0 : index
    %c0_17 = arith.constant 0 : index
    %49 = vector.load %arg4[%c0_16, %c0_17] : memref<32x224xf32, #tpu.memory_space<vmem>>, vector<32x224xf32>
    %cst_18 = arith.constant dense<0.000000e+00> : vector<32x192xf32>
    %50 = tpu.matmul %49, %48, %cst_18 {dimension_numbers = #tpu.dot_dimension_numbers<[1], [0], [0], [1], [0, 0, 1, 1], [], []>} : vector<32x224xf32>, vector<224x192xf32>, vector<32x192xf32> -> vector<32x192xf32>
    %c0_19 = arith.constant 0 : index
    %c0_20 = arith.constant 0 : index
    %51 = vector.load %arg5[%c0_19, %c0_20] : memref<32x1xf32, #tpu.memory_space<vmem>>, vector<32x1xf32>
    %52 = vector.broadcast %51 : vector<32x1xf32> to vector<32x192xf32>
    %53 = arith.addf %50, %52 : vector<32x192xf32>
    %cst_21 = arith.constant 0.000000e+00 : f32
    %54 = vector.broadcast %cst_21 : f32 to vector<32x192xf32>
    %55 = arith.maximumf %53, %54 : vector<32x192xf32>
    %56 = vector.extract_strided_slice %0 {offsets = [0, 0], sizes = [192, 96], strides = [1, 1]} : vector<256x128xf32> to vector<192x96xf32>
    %cst_22 = arith.constant dense<0.000000e+00> : vector<32x96xf32>
    %57 = tpu.matmul %55, %56, %cst_22 {dimension_numbers = #tpu.dot_dimension_numbers<[1], [0], [0], [1], [0, 0, 1, 1], [], []>} : vector<32x192xf32>, vector<192x96xf32>, vector<32x96xf32> -> vector<32x96xf32>
    %c0_23 = arith.constant 0 : index
    %c0_24 = arith.constant 0 : index
    %58 = vector.load %arg12[%c0_23, %c0_24] : memref<1x96xf32, #tpu.memory_space<vmem>>, vector<1x96xf32>
    %cst_25 = arith.constant 5.000000e-01 : f32
    %59 = vector.broadcast %cst_25 : f32 to vector<1x96xf32>
    %60 = arith.cmpf ogt, %58, %59 : vector<1x96xf32>
    %cst_26 = arith.constant 0.000000e+00 : f32
    %61 = vector.shape_cast %60 : vector<1x96xi1> to vector<1x96xi1>
    %62 = vector.broadcast %61 : vector<1x96xi1> to vector<32x96xi1>
    %63 = vector.broadcast %cst_26 : f32 to vector<32x96xf32>
    %64 = arith.select %62, %57, %63 : vector<32x96xi1>, vector<32x96xf32>
    %cst_27 = arith.constant 0.000000e+00 : f32
    %65 = vector.broadcast %cst_27 : f32 to vector<32x3xf32>
    %66 = tpu.concatenate %65, %64, %65 in 1 : vector<32x3xf32>, vector<32x96xf32>, vector<32x3xf32> -> vector<32x102xf32>
    %67 = vector.extract_strided_slice %66 {offsets = [0, 0], sizes = [32, 96], strides = [1, 1]} : vector<32x102xf32> to vector<32x96xf32>
    %68 = vector.extract_strided_slice %66 {offsets = [0, 1], sizes = [32, 96], strides = [1, 1]} : vector<32x102xf32> to vector<32x96xf32>
    %69 = vector.extract_strided_slice %66 {offsets = [0, 2], sizes = [32, 96], strides = [1, 1]} : vector<32x102xf32> to vector<32x96xf32>
    %70 = vector.extract_strided_slice %66 {offsets = [0, 3], sizes = [32, 96], strides = [1, 1]} : vector<32x102xf32> to vector<32x96xf32>
    %71 = vector.extract_strided_slice %66 {offsets = [0, 4], sizes = [32, 96], strides = [1, 1]} : vector<32x102xf32> to vector<32x96xf32>
    %72 = vector.extract_strided_slice %66 {offsets = [0, 5], sizes = [32, 96], strides = [1, 1]} : vector<32x102xf32> to vector<32x96xf32>
    %73 = vector.extract_strided_slice %66 {offsets = [0, 6], sizes = [32, 96], strides = [1, 1]} : vector<32x102xf32> to vector<32x96xf32>
    %74 = tpu.concatenate %67, %68, %69, %70, %71, %72, %73 in 0 : vector<32x96xf32>, vector<32x96xf32>, vector<32x96xf32>, vector<32x96xf32>, vector<32x96xf32>, vector<32x96xf32>, vector<32x96xf32> -> vector<224x96xf32>
    %c0_28 = arith.constant 0 : index
    %c0_29 = arith.constant 0 : index
    %75 = vector.load %arg6[%c0_28, %c0_29] : memref<32x224xf32, #tpu.memory_space<vmem>>, vector<32x224xf32>
    %cst_30 = arith.constant dense<0.000000e+00> : vector<32x96xf32>
    %76 = tpu.matmul %75, %74, %cst_30 {dimension_numbers = #tpu.dot_dimension_numbers<[1], [0], [0], [1], [0, 0, 1, 1], [], []>} : vector<32x224xf32>, vector<224x96xf32>, vector<32x96xf32> -> vector<32x96xf32>
    %c0_31 = arith.constant 0 : index
    %c0_32 = arith.constant 0 : index
    %77 = vector.load %arg7[%c0_31, %c0_32] : memref<32x1xf32, #tpu.memory_space<vmem>>, vector<32x1xf32>
    %78 = vector.broadcast %77 : vector<32x1xf32> to vector<32x96xf32>
    %79 = arith.addf %76, %78 : vector<32x96xf32>
    %cst_33 = arith.constant 0.000000e+00 : f32
    %80 = vector.broadcast %cst_33 : f32 to vector<32x96xf32>
    %81 = arith.maximumf %79, %80 : vector<32x96xf32>
    %82 = vector.extract_strided_slice %0 {offsets = [0, 0], sizes = [96, 48], strides = [1, 1]} : vector<256x128xf32> to vector<96x48xf32>
    %cst_34 = arith.constant dense<0.000000e+00> : vector<32x48xf32>
    %83 = tpu.matmul %81, %82, %cst_34 {dimension_numbers = #tpu.dot_dimension_numbers<[1], [0], [0], [1], [0, 0, 1, 1], [], []>} : vector<32x96xf32>, vector<96x48xf32>, vector<32x48xf32> -> vector<32x48xf32>
    %c0_35 = arith.constant 0 : index
    %c0_36 = arith.constant 0 : index
    %84 = vector.load %arg13[%c0_35, %c0_36] : memref<1x48xf32, #tpu.memory_space<vmem>>, vector<1x48xf32>
    %cst_37 = arith.constant 5.000000e-01 : f32
    %85 = vector.broadcast %cst_37 : f32 to vector<1x48xf32>
    %86 = arith.cmpf ogt, %84, %85 : vector<1x48xf32>
    %cst_38 = arith.constant 0.000000e+00 : f32
    %87 = vector.shape_cast %86 : vector<1x48xi1> to vector<1x48xi1>
    %88 = vector.broadcast %87 : vector<1x48xi1> to vector<32x48xi1>
    %89 = vector.broadcast %cst_38 : f32 to vector<32x48xf32>
    %90 = arith.select %88, %83, %89 : vector<32x48xi1>, vector<32x48xf32>
    %cst_39 = arith.constant 0.000000e+00 : f32
    %91 = vector.broadcast %cst_39 : f32 to vector<32x3xf32>
    %92 = tpu.concatenate %91, %90, %91 in 1 : vector<32x3xf32>, vector<32x48xf32>, vector<32x3xf32> -> vector<32x54xf32>
    %93 = vector.extract_strided_slice %92 {offsets = [0, 0], sizes = [32, 48], strides = [1, 1]} : vector<32x54xf32> to vector<32x48xf32>
    %94 = vector.extract_strided_slice %92 {offsets = [0, 1], sizes = [32, 48], strides = [1, 1]} : vector<32x54xf32> to vector<32x48xf32>
    %95 = vector.extract_strided_slice %92 {offsets = [0, 2], sizes = [32, 48], strides = [1, 1]} : vector<32x54xf32> to vector<32x48xf32>
    %96 = vector.extract_strided_slice %92 {offsets = [0, 3], sizes = [32, 48], strides = [1, 1]} : vector<32x54xf32> to vector<32x48xf32>
    %97 = vector.extract_strided_slice %92 {offsets = [0, 4], sizes = [32, 48], strides = [1, 1]} : vector<32x54xf32> to vector<32x48xf32>
    %98 = vector.extract_strided_slice %92 {offsets = [0, 5], sizes = [32, 48], strides = [1, 1]} : vector<32x54xf32> to vector<32x48xf32>
    %99 = vector.extract_strided_slice %92 {offsets = [0, 6], sizes = [32, 48], strides = [1, 1]} : vector<32x54xf32> to vector<32x48xf32>
    %100 = tpu.concatenate %93, %94, %95, %96, %97, %98, %99 in 0 : vector<32x48xf32>, vector<32x48xf32>, vector<32x48xf32>, vector<32x48xf32>, vector<32x48xf32>, vector<32x48xf32>, vector<32x48xf32> -> vector<224x48xf32>
    %c0_40 = arith.constant 0 : index
    %c0_41 = arith.constant 0 : index
    %101 = vector.load %arg8[%c0_40, %c0_41] : memref<8x224xf32, #tpu.memory_space<vmem>>, vector<8x224xf32>
    %cst_42 = arith.constant dense<0.000000e+00> : vector<8x48xf32>
    %102 = tpu.matmul %101, %100, %cst_42 {dimension_numbers = #tpu.dot_dimension_numbers<[1], [0], [0], [1], [0, 0, 1, 1], [], []>} : vector<8x224xf32>, vector<224x48xf32>, vector<8x48xf32> -> vector<8x48xf32>
    %c0_43 = arith.constant 0 : index
    %c0_44 = arith.constant 0 : index
    %103 = vector.load %arg9[%c0_43, %c0_44] : memref<8x1xf32, #tpu.memory_space<vmem>>, vector<8x1xf32>
    %104 = vector.broadcast %103 : vector<8x1xf32> to vector<8x48xf32>
    %105 = arith.addf %102, %104 : vector<8x48xf32>
    %cst_45 = arith.constant 0.000000e+00 : f32
    %106 = vector.broadcast %cst_45 : f32 to vector<8x48xf32>
    %107 = arith.maximumf %105, %106 : vector<8x48xf32>
    %108 = vector.extract_strided_slice %0 {offsets = [0, 0], sizes = [48, 24], strides = [1, 1]} : vector<256x128xf32> to vector<48x24xf32>
    %cst_46 = arith.constant dense<0.000000e+00> : vector<8x24xf32>
    %109 = tpu.matmul %107, %108, %cst_46 {dimension_numbers = #tpu.dot_dimension_numbers<[1], [0], [0], [1], [0, 0, 1, 1], [], []>} : vector<8x48xf32>, vector<48x24xf32>, vector<8x24xf32> -> vector<8x24xf32>
    %110 = vector.extract_strided_slice %109 {offsets = [0, 0], sizes = [8, 8], strides = [1, 1]} : vector<8x24xf32> to vector<8x8xf32>
    %111 = vector.extract_strided_slice %109 {offsets = [0, 12], sizes = [8, 8], strides = [1, 1]} : vector<8x24xf32> to vector<8x8xf32>
    %112 = tpu.concatenate %110, %111 in 1 : vector<8x8xf32>, vector<8x8xf32> -> vector<8x16xf32>
    %c0_47 = arith.constant 0 : index
    %c0_48 = arith.constant 0 : index
    %c0_49 = arith.constant 0 : index
    %113 = vector.load %arg14[%c0_47, %c0_48, %c0_49] : memref<1x8x16xf32, #tpu.memory_space<vmem>>, vector<1x8x16xf32>
    %114 = vector.shape_cast %113 : vector<1x8x16xf32> to vector<8x16xf32>
    %115 = vector.shape_cast %112 : vector<8x16xf32> to vector<1x8x16xf32>
    tpu.vector_store %arg14[%c0_47, %c0_48, %c0_49], %115 {strides = array<i32>} : memref<1x8x16xf32, #tpu.memory_space<vmem>>, vector<1x8x16xf32>,
    return
  }
  func.func @transform_0(%arg0: i32) -> (i32, i32, i32) {
    %c0_i32 = arith.constant 0 : i32
    %c0_i32_0 = arith.constant 0 : i32
    %c0_i32_1 = arith.constant 0 : i32
    return %arg0, %c0_i32, %c0_i32_0 : i32, i32, i32
  }
  func.func @transform_1(%arg0: i32) -> (i32, i32) {
    %c0_i32 = arith.constant 0 : i32
    %c0_i32_0 = arith.constant 0 : i32
    %c0_i32_1 = arith.constant 0 : i32
    return %c0_i32, %c0_i32_0 : i32, i32
  }
  func.func @transform_2(%arg0: i32) -> (i32, i32) {
    %c0_i32 = arith.constant 0 : i32
    %c0_i32_0 = arith.constant 0 : i32
    %c0_i32_1 = arith.constant 0 : i32
    return %c0_i32, %c0_i32_0 : i32, i32
  }
  func.func @transform_3(%arg0: i32) -> (i32, i32) {
    %c0_i32 = arith.constant 0 : i32
    %c0_i32_0 = arith.constant 0 : i32
    %c0_i32_1 = arith.constant 0 : i32
    return %c0_i32, %c0_i32_0 : i32, i32
  }
  func.func @transform_4(%arg0: i32) -> (i32, i32) {
    %c0_i32 = arith.constant 0 : i32
    %c0_i32_0 = arith.constant 0 : i32
    %c0_i32_1 = arith.constant 0 : i32
    return %c0_i32, %c0_i32_0 : i32, i32
  }
  func.func @transform_5(%arg0: i32) -> (i32, i32) {
    %c0_i32 = arith.constant 0 : i32
    %c0_i32_0 = arith.constant 0 : i32
    %c0_i32_1 = arith.constant 0 : i32
    return %c0_i32, %c0_i32_0 : i32, i32
  }
  func.func @transform_6(%arg0: i32) -> (i32, i32) {
    %c0_i32 = arith.constant 0 : i32
    %c0_i32_0 = arith.constant 0 : i32
    %c0_i32_1 = arith.constant 0 : i32
    return %c0_i32, %c0_i32_0 : i32, i32
  }
  func.func @transform_7(%arg0: i32) -> (i32, i32) {
    %c0_i32 = arith.constant 0 : i32
    %c0_i32_0 = arith.constant 0 : i32
    %c0_i32_1 = arith.constant 0 : i32
    return %c0_i32, %c0_i32_0 : i32, i32
  }
  func.func @transform_8(%arg0: i32) -> (i32, i32) {
    %c0_i32 = arith.constant 0 : i32
    %c0_i32_0 = arith.constant 0 : i32
    %c0_i32_1 = arith.constant 0 : i32
    return %c0_i32, %c0_i32_0 : i32, i32
  }
  func.func @transform_9(%arg0: i32) -> (i32, i32) {
    %c0_i32 = arith.constant 0 : i32
    %c0_i32_0 = arith.constant 0 : i32
    %c0_i32_1 = arith.constant 0 : i32
    return %c0_i32, %c0_i32_0 : i32, i32
  }
  func.func @transform_10(%arg0: i32) -> (i32, i32) {
    %c0_i32 = arith.constant 0 : i32
    %c0_i32_0 = arith.constant 0 : i32
    %c0_i32_1 = arith.constant 0 : i32
    return %c0_i32, %c0_i32_0 : i32, i32
  }
  func.func @transform_11(%arg0: i32) -> (i32, i32) {
    %c0_i32 = arith.constant 0 : i32
    %c0_i32_0 = arith.constant 0 : i32
    %c0_i32_1 = arith.constant 0 : i32
    return %c0_i32, %c0_i32_0 : i32, i32
  }
  func.func @transform_12(%arg0: i32) -> (i32, i32) {
    %c0_i32 = arith.constant 0 : i32
    %c0_i32_0 = arith.constant 0 : i32
    %c0_i32_1 = arith.constant 0 : i32
    return %c0_i32, %c0_i32_0 : i32, i32
  }
  func.func @transform_13(%arg0: i32) -> (i32, i32, i32) {
    %c0_i32 = arith.constant 0 : i32
    %c0_i32_0 = arith.constant 0 : i32
    %c0_i32_1 = arith.constant 0 : i32
    return %arg0, %c0_i32, %c0_i32_0 : i32, i32, i32
  }
}

</mosaic_0001>

<bundles_post_ra>
// kernel: embedding_forward.1
= control target key start
LH: loop header
LB: loop body
LE: loop exit
PB: predicated region body
PF: predicated region fallthrough
CT: control target
= control target key end

     0   :  { %s1969_s27 = smov 120   ;;  %s1970_s28 = smov 119   ;;  %vm222_vm0 = vcmask 973824   ;;  %vm206_vm1 = vcmask 982016   ;;  %vm310_vm2 = vcmask 1040384   ;;  %vm110_vm3 = vcmask 1031168   ;;  %s2945_s0 = inlined_call_operand.vmem [shape: f32[1,1,512], index: 0, kind: input, shape index: {}]   ;;  %s2946_s2 = inlined_call_operand.vmem [shape: f32[32,1], index: 2, kind: input, shape index: {}]   ;;  %s2947_s1 = inlined_call_operand.vmem [shape: f32[32,15], index: 1, kind: input, shape index: {}]   ;;  %s2948_s9 = inlined_call_operand.vmem [shape: f32[256,128], index: 9, kind: input, shape index: {}]   ;;  %s2949_s10 = inlined_call_operand.vmem [shape: f32[1,192], index: 10, kind: input, shape index: {}]   ;;  %s2950_s4 = inlined_call_operand.vmem [shape: f32[32,1], index: 4, kind: input, shape index: {}]   ;;  %s2951_s3 = inlined_call_operand.vmem [shape: f32[32,224], index: 3, kind: input, shape index: {}]   ;;  %s2952_s11 = inlined_call_operand.vmem [shape: f32[1,96], index: 11, kind: input, shape index: {}]   ;;  %s2953_s6 = inlined_call_operand.vmem [shape: f32[32,1], index: 6, kind: input, shape index: {}]   ;;  %s2954_s5 = inlined_call_operand.vmem [shape: f32[32,224], index: 5, kind: input, shape index: {}]   ;;  %s2955_s12 = inlined_call_operand.vmem [shape: f32[1,48], index: 12, kind: input, shape index: {}]   ;;  %s2956_s8 = inlined_call_operand.vmem [shape: f32[8,1], index: 8, kind: input, shape index: {}]   ;;  %s2957_s7 = inlined_call_operand.vmem [shape: f32[8,224], index: 7, kind: input, shape index: {}]   ;;  %s2958_s13 = inlined_call_operand.vmem [shape: f32[1,8,16], index: 13, kind: output, shape index: {}]  }
   0x1   :  { %v76_v0 = vld [vmem:[%s2945_s0] sm:$0xf]  ;;  %s1971_s0 = smov 118   ;;  %s1972_s29 = smov 127   ;;  %vm94_vm4 = vcmask 1039360   ;;  %vm315_vm5 = vcmask 1041408  }
   0x2   :  { %v2058_v1 = vperm.slane %v76_v0, 2  ;;  %v2060_v2 = vperm.slane %v76_v0, 1  ;;  %v2062_v3 = vperm.slane %v76_v0, 0  ;;  %v2069_v4 = vperm.slane %v76_v0, 3  ;;  %s1973_s30 = smov 126   ;;  %s1974_s14 = smov 117  }
   0x3   :  { %s1975_s15 = smov 125   ;;  %s1976_s16 = smov 116   ;;  %vm238_vm6 = vcmask 965632   ;;  %vm254_vm7 = vcmask 957440   ;;  %vm270_vm8 = vcmask 949248   ;;  %vm286_vm9 = vcmask 941056  }
   0x4   :  { %202 = vrot.lane.b32.xlu1 %v2058_v1, %s1969_s27  ;;  %216 = vrot.lane.b32.xlu2 %v2060_v2, %s1970_s28  ;;  %v1645_v5 = vpack.i.bf16 %v2069_v4, %v2058_v1  ;;  %v1640_v6 = vpack.i.bf16 %v2060_v2, %v2062_v3  ;;  %s1977_s17 = smov 124   ;;  %s1978_s18 = smov 115   ;;  %vm320_vm10 = vcmask 1042432   ;;  %vm126_vm11 = vcmask 1022976  }
   0x5   :  { %198 = vrot.lane.b32.xlu0 %v2062_v3, %s1969_s27  ;;  %s1979_s19 = smov 123   ;;  %s1980_s20 = smov 114   ;;  %vm325_vm12 = vcmask 1043456   ;;  %vm330_vm13 = vcmask 1044480   ;;  %vm302_vm14 = vcmask 932864   ;;  %vm335_vm15 = vcmask 1045504  }
   0x6   :  { %s1981_s21 = smov 122   ;;  %s1982_s22 = smov 121  }
   0xc   :  { %218 = vrot.lane.b32.xlu2 %v2058_v1, %s1970_s28  ;;  %214 = vrot.lane.b32.xlu1 %v2062_v3, %s1970_s28 }
   0xd   :  { %200 = vrot.lane.b32.xlu0 %v2060_v2, %s1969_s27 }
  0x14   :  { %230 = vrot.lane.b32.xlu2 %v2062_v3, %s1971_s0  ;;  %1646 = vrot.lane.b32.xlu1 %v1645_v5, %s1972_s29 }
  0x15   :  { %1641 = vrot.lane.b32.xlu0 %v1640_v6, %s1972_s29 }
  0x1c   :  { %1651 = vrot.lane.b32.xlu2 %v1640_v6, %s1973_s30  ;;  %234 = vrot.lane.b32.xlu1 %v2058_v1, %s1971_s0 }
  0x1d   :  { %232 = vrot.lane.b32.xlu0 %v2060_v2, %s1971_s0 }
  0x24   :  { %220 = vrot.lane.b32.xlu2 %v2069_v4, %s1970_s28  ;;  %204 = vrot.lane.b32.xlu1 %v2069_v4, %s1969_s27 }
  0x25   :  { %1656 = vrot.lane.b32.xlu0 %v1645_v5, %s1973_s30 }
  0x2c   :  { %250 = vrot.lane.b32.xlu2 %v2058_v1, %s1974_s14  ;;  %248 = vrot.lane.b32.xlu1 %v2060_v2, %s1974_s14 }
  0x2d   :  { %246 = vrot.lane.b32.xlu0 %v2062_v3, %s1974_s14 }
  0x34   :  { %236 = vrot.lane.b32.xlu2 %v2069_v4, %s1971_s0  ;;  %1666 = vrot.lane.b32.xlu1 %v1645_v5, %s1975_s15 }
  0x35   :  { %1661 = vrot.lane.b32.xlu0 %v1640_v6, %s1975_s15 }
  0x3c   :  { %266 = vrot.lane.b32.xlu2 %v2058_v1, %s1976_s16  ;;  %264 = vrot.lane.b32.xlu1 %v2060_v2, %s1976_s16 }
  0x3d   :  { %262 = vrot.lane.b32.xlu0 %v2062_v3, %s1976_s16 }
  0x44   :  { %252 = vrot.lane.b32.xlu2 %v2069_v4, %s1974_s14  ;;  %1676 = vrot.lane.b32.xlu1 %v1645_v5, %s1977_s17 }
  0x45   :  { %1671 = vrot.lane.b32.xlu0 %v1640_v6, %s1977_s17 }
  0x4c   :  { %282 = vrot.lane.b32.xlu2 %v2058_v1, %s1978_s18  ;;  %280 = vrot.lane.b32.xlu1 %v2060_v2, %s1978_s18 }
  0x4d   :  { %278 = vrot.lane.b32.xlu0 %v2062_v3, %s1978_s18 }
  0x54   :  { %268 = vrot.lane.b32.xlu2 %v2069_v4, %s1976_s16  ;;  %1686 = vrot.lane.b32.xlu1 %v1645_v5, %s1979_s19 }
  0x55   :  { %1681 = vrot.lane.b32.xlu0 %v1640_v6, %s1979_s19 }
  0x5c   :  { %298 = vrot.lane.b32.xlu2 %v2058_v1, %s1980_s20  ;;  %296 = vrot.lane.b32.xlu1 %v2060_v2, %s1980_s20 }
  0x5d   :  { %294 = vrot.lane.b32.xlu0 %v2062_v3, %s1980_s20 }
  0x5e   :  { %v217_v7 = vpop.permute.xlu2 %216 }
  0x64   :  { %284 = vrot.lane.b32.xlu2 %v2069_v4, %s1978_s18  ;;  %1696 = vrot.lane.b32.xlu1 %v1645_v5, %s1981_s21 }
  0x65   :  { %1691 = vrot.lane.b32.xlu0 %v1640_v6, %s1981_s21 }
  0x66   :  { %v219_v8 = vpop.permute.xlu2 %218 }
  0x67   :  { %v224_v9 = vsel %vm222_vm0, %v217_v7, %v219_v8 }
  0x6c   :  { %300 = vrot.lane.b32.xlu2 %v2069_v4, %s1980_s20  ;;  %1706 = vrot.lane.b32.xlu1 %v1645_v5, %s1982_s22 }
  0x6d   :  { %1701 = vrot.lane.b32.xlu0 %v1640_v6, %s1982_s22 }
  0x6e   :  { %v231_v10 = vpop.permute.xlu2 %230 }
  0x76   :  { %v203_v11 = vpop.permute.xlu1 %202  ;;  %v1652_v12 = vpop.permute.xlu2 %1651 }
  0x77   :  { %v199_v13 = vpop.permute.xlu0 %198  ;;  %v1654_v23 = vunpack.i.h.bf16 %v1652_v12  ;;  %v1653_v24 = vunpack.i.l.bf16 %v1652_v12 }
  0x79   :  { %v111_v31 = vsel %vm110_vm3, %v1653_v24, %v1654_v23 }
  0x7e   :  { %v2111_v14 = vpop.permute.xlu2 %220  ;;  %v215_v15 = vpop.permute.xlu1 %214 }
  0x7f   :  { %v225_v16 = vsel %vm222_vm0, %v219_v8, %v2111_v14  ;;  %v223_v17 = vsel %vm222_vm0, %v215_v15, %v217_v7  ;;  %v201_v18 = vpop.permute.xlu0 %200  ;;  %vm142_vm0 = vcmask 1014784  }
  0x80   :  { %v207_v19 = vsel %vm206_vm1, %v199_v13, %v201_v18  ;;  %v208_v20 = vsel %vm206_vm1, %v201_v18, %v203_v11 }
  0x81   :  { %v345_v21 = vsel %vm310_vm2, %v207_v19, %v223_v17  ;;  %v2120_v22 = vsel %vm310_vm2, %v208_v20, %v224_v9 }
  0x86   :  { %v2122_v25 = vpop.permute.xlu2 %250  ;;  %v1647_v26 = vpop.permute.xlu1 %1646 }
  0x87   :  { %v1648_v27 = vunpack.i.l.bf16 %v1647_v26  ;;  %v1642_v28 = vpop.permute.xlu0 %1641  ;;  %v1649_v41 = vunpack.i.h.bf16 %v1647_v26 }
  0x88   :  { %v1644_v29 = vunpack.i.h.bf16 %v1642_v28  ;;  %v1643_v30 = vunpack.i.l.bf16 %v1642_v28 }
  0x89   :  { %v97_v42 = vsel %vm94_vm4, %v1648_v27, %v1649_v41  ;;  %v314_v51 = vsel %vm310_vm2, %v2069_v4, %v1649_v41 }
  0x8a   :  { %v96_v32 = vsel %vm94_vm4, %v1644_v29, %v1648_v27  ;;  %v95_v33 = vsel %vm94_vm4, %v1643_v30, %v1644_v29  ;;  %v313_v52 = vsel %vm310_vm2, %v2058_v1, %v97_v42 }
  0x8b   :  { %v311_v34 = vsel %vm310_vm2, %v2062_v3, %v95_v33  ;;  %v312_v54 = vsel %vm310_vm2, %v2060_v2, %v96_v32 }
  0x8c   :  { %v2130_v35 = vsel %vm315_vm5, %v311_v34, %v111_v31 }
  0x8e   :  { %v2132_v36 = vpop.permute.xlu2 %236  ;;  %v235_v37 = vpop.permute.xlu1 %234 }
  0x8f   :  { %v233_v38 = vpop.permute.xlu0 %232  ;;  %v241_v47 = vsel %vm238_vm6, %v235_v37, %v2132_v36 }
  0x90   :  { %v239_v39 = vsel %vm238_vm6, %v231_v10, %v233_v38  ;;  %v240_v12 = vsel %vm238_vm6, %v233_v38, %v235_v37  ;;  %vm340_vm6 = vcmask 1046528  }
  0x91   :  { %v349_v40 = vsel %vm315_vm5, %v345_v21, %v239_v39  ;;  %v350_v18 = vsel %vm315_vm5, %v2120_v22, %v240_v12 }
  0x96   :  { %v205_v43 = vpop.permute.xlu1 %204  ;;  %v2137_v44 = vpop.permute.xlu2 %266 }
  0x97   :  { %v209_v45 = vsel %vm206_vm1, %v203_v11, %v205_v43  ;;  %v1657_v46 = vpop.permute.xlu0 %1656  ;;  %v348_v27 = vsel %vm310_vm2, %v205_v43, %v2111_v14  ;;  %vm158_vm1 = vcmask 1006592  }
  0x98   :  { %v347_v48 = vsel %vm310_vm2, %v209_v45, %v225_v16  ;;  %v1659_v49 = vunpack.i.h.bf16 %v1657_v46  ;;  %v1658_v50 = vunpack.i.l.bf16 %v1657_v46  ;;  %v352_v41 = vsel %vm315_vm5, %v348_v27, %v2132_v36 }
  0x99   :  { %v2148_v53 = vsel %vm315_vm5, %v347_v48, %v241_v47  ;;  %vm174_vm2 = vcmask 998400  }
  0x9a   :  { %v2153_v55 = vsel %vm315_vm5, %v314_v51, %v1659_v49  ;;  %v112_v56 = vsel %vm110_vm3, %v1654_v23, %v1658_v50  ;;  %v113_v57 = vsel %vm110_vm3, %v1658_v50, %v1659_v49 }
  0x9b   :  { %v2158_v58 = vsel %vm315_vm5, %v312_v54, %v112_v56  ;;  %v2161_v59 = vsel %vm315_vm5, %v313_v52, %v113_v57  ;;  %vm190_vm5 = vcmask 990208  }
  0x9e   :  { %v249_v60 = vpop.permute.xlu1 %248  ;;  %v253_v62 = vpop.permute.xlu2 %252 }
  0x9f   :  { %v247_v61 = vpop.permute.xlu0 %246  ;;  %v256_v15 = vsel %vm254_vm7, %v249_v60, %v2122_v25  ;;  %v257_v34 = vsel %vm254_vm7, %v2122_v25, %v253_v62  ;;  %v356_v45 = vsel %vm320_vm10, %v352_v41, %v253_v62 }
  0xa0   :  { %v255_v16 = vsel %vm254_vm7, %v247_v61, %v249_v60  ;;  %v354_v21 = vsel %vm320_vm10, %v350_v18, %v256_v15  ;;  %v355_v25 = vsel %vm320_vm10, %v2148_v53, %v257_v34  ;;  %vm430_vm7 = vcmask 121856  }
  0xa1   :  { %v353_v28 = vsel %vm320_vm10, %v349_v40, %v255_v16 }
  0xa6   :  { %v2163_v63 = vpop.permute.xlu1 %1666  ;;  %v2167_v1 = vpop.permute.xlu2 %282 }
  0xa7   :  { %v2165_v0 = vpop.permute.xlu0 %1661  ;;  %v1669_v23 = vunpack.i.h.bf16 %v2163_v63  ;;  %v1668_v24 = vunpack.i.l.bf16 %v2163_v63 }
  0xa8   :  { %v1664_v42 = vunpack.i.h.bf16 %v2165_v0  ;;  %v1663_v43 = vunpack.i.l.bf16 %v2165_v0 }
  0xa9   :  { %v129_v39 = vsel %vm126_vm11, %v1668_v24, %v1669_v23  ;;  %v324_v36 = vsel %vm320_vm10, %v2153_v55, %v1669_v23 }
  0xaa   :  { %v323_v47 = vsel %vm320_vm10, %v2161_v59, %v129_v39  ;;  %v128_v54 = vsel %vm126_vm11, %v1664_v42, %v1668_v24  ;;  %v127_v56 = vsel %vm126_vm11, %v1663_v43, %v1664_v42 }
  0xae   :  { %v265_v2 = vpop.permute.xlu1 %264  ;;  %v2169_v4 = vpop.permute.xlu2 %268 }
  0xaf   :  { %v263_v3 = vpop.permute.xlu0 %262  ;;  %v272_v17 = vsel %vm270_vm8, %v265_v2, %v2137_v44  ;;  %v273_v48 = vsel %vm270_vm8, %v2137_v44, %v2169_v4  ;;  %v360_v55 = vsel %vm325_vm12, %v356_v45, %v2169_v4 }
  0xb0   :  { %v271_v19 = vsel %vm270_vm8, %v263_v3, %v265_v2  ;;  %v358_v22 = vsel %vm325_vm12, %v354_v21, %v272_v17  ;;  %v359_v59 = vsel %vm325_vm12, %v355_v25, %v273_v48  ;;  %v1983_v48 = vmov 0  }
  0xb1   :  { %v357_v30 = vsel %vm325_vm12, %v353_v28, %v271_v19  ;;  %1720 = vset.pattern.permute.xlu0 %v1983_v48  ;;  %1721 = vset.pattern.permute.xlu1 %v1983_v48 }
  0xb2   :  { %1722 = vset.pattern.permute.xlu2 %v1983_v48 }
  0xb6   :  { %v2171_v5 = vpop.permute.xlu1 %1676  ;;  %v299_v8 = vpop.permute.xlu2 %298 }
  0xb7   :  { %v2173_v6 = vpop.permute.xlu0 %1671  ;;  %v1679_v49 = vunpack.i.h.bf16 %v2171_v5  ;;  %v1678_v50 = vunpack.i.l.bf16 %v2171_v5 }
  0xb8   :  { %v1674_v51 = vunpack.i.h.bf16 %v2173_v6  ;;  %v1673_v52 = vunpack.i.l.bf16 %v2173_v6 }
  0xb9   :  { %v145_v4 = vsel %vm142_vm0, %v1678_v50, %v1679_v49  ;;  %v329_v17 = vsel %vm325_vm12, %v324_v36, %v1679_v49  ;;  %v373_v36 = vld [vmem:[%s2946_s2] sm:$0xff]  ;;  %v374_v49 = vld [vmem:[%s2946_s2 + $0x8] sm:$0xff] }
  0xba   :  { %v144_v5 = vsel %vm142_vm0, %v1674_v51, %v1678_v50  ;;  %v143_v6 = vsel %vm142_vm0, %v1673_v52, %v1674_v51  ;;  %v328_v16 = vsel %vm325_vm12, %v323_v47, %v145_v4 }
  0xbe   :  { %v281_v7 = vpop.permute.xlu1 %280  ;;  %v285_v13 = vpop.permute.xlu2 %284 }
  0xbf   :  { %v279_v9 = vpop.permute.xlu0 %278  ;;  %v288_v20 = vsel %vm286_vm9, %v281_v7, %v2167_v1  ;;  %v289_v53 = vsel %vm286_vm9, %v2167_v1, %v285_v13  ;;  %v364_v60 = vsel %vm330_vm13, %v360_v55, %v285_v13  ;;  %v322_v13 = vsel %vm320_vm10, %v2158_v58, %v128_v54  ;;  %v369_v55 = vld [vmem:[%s2947_s1] sm:$0xff] }
  0xc0   :  { %v287_v26 = vsel %vm286_vm9, %v279_v9, %v281_v7  ;;  %v362_v33 = vsel %vm330_vm13, %v358_v22, %v288_v20  ;;  %v363_v3 = vsel %vm330_vm13, %v359_v59, %v289_v53  ;;  %v327_v20 = vsel %vm325_vm12, %v322_v13, %v144_v5  ;;  %v376_v59 = vld [vmem:[%s2946_s2 + $0x18] sm:$0xff]  ;;  %v72_v13 = vld [vmem:[%s2948_s9 + $0xe0] sm:$0xff] }
  0xc1   :  { %v361_v38 = vsel %vm330_vm13, %v357_v30, %v287_v26 }
  0xc6   :  { %v2175_v10 = vpop.permute.xlu1 %1686  ;;  %v301_v46 = vpop.permute.xlu2 %300 }
  0xc7   :  { %v2177_v11 = vpop.permute.xlu0 %1681  ;;  %v305_v44 = vsel %vm302_vm14, %v299_v8, %v301_v46  ;;  %v1689_v61 = vunpack.i.h.bf16 %v2175_v10  ;;  %v1688_v62 = vunpack.i.l.bf16 %v2175_v10  ;;  %v368_v2 = vsel %vm335_vm15, %v364_v60, %v301_v46  ;;  %v375_v60 = vld [vmem:[%s2946_s2 + $0x10] sm:$0xff]  ;;  %s1984_s2 = smov 3  }
  0xc8   :  { %v1684_v0 = vunpack.i.h.bf16 %v2177_v11  ;;  %v1683_v1 = vunpack.i.l.bf16 %v2177_v11  ;;  %v367_v7 = vsel %vm335_vm15, %v363_v3, %v305_v44  ;;  %v321_v11 = vsel %vm320_vm10, %v2130_v35, %v127_v56  ;;  %v75_v3 = vld [vmem:[%s2948_s9 + $0xf8] sm:$0xff] }
  0xc9   :  { %v161_v15 = vsel %vm158_vm1, %v1688_v62, %v1689_v61  ;;  %v326_v19 = vsel %vm325_vm12, %v321_v11, %v143_v6  ;;  %v334_v58 = vsel %vm330_vm13, %v329_v17, %v1689_v61  ;;  %v2305_v61 = vld [vmem:[%s2948_s9 + $0x78] sm:$0xff]  ;;  %v74_v6 = vld [vmem:[%s2948_s9 + $0xf0] sm:$0xff]  ;;  %v2342_v11 = vld [vmem:[%s2948_s9 + $0x60] sm:$0xff]  ;;  %vm674_vm12 = vcmask 23552  }
  0xca   :  { %v159_v18 = vsel %vm158_vm1, %v1683_v1, %v1684_v0  ;;  %v160_v21 = vsel %vm158_vm1, %v1684_v0, %v1688_v62  ;;  %v333_v35 = vsel %vm330_vm13, %v328_v16, %v161_v15  ;;  %548 = vmatpush.msra.mxu3 %v2305_v61  ;;  %v2352_v15 = vld [vmem:[%s2948_s9 + $0x58] sm:$0xff]  ;;  %v2362_v17 = vld [vmem:[%s2948_s9 + $0x50] sm:$0xff] }
  0xcb   :  { %v331_v27 = vsel %vm330_vm13, %v326_v19, %v159_v18  ;;  %v71_v16 = vld [vmem:[%s2948_s9 + $0xd8] sm:$0xff]  ;;  %v371_v18 = vld [vmem:[%s2947_s1 + $0x10] sm:$0xff]  ;;  %v2372_v19 = vld [vmem:[%s2948_s9 + $0x48] sm:$0xff] }
  0xce   :  { %v297_v29 = vpop.permute.xlu1 %296 }
  0xcf   :  { %v304_v31 = vsel %vm302_vm14, %v297_v29, %v299_v8  ;;  %v295_v32 = vpop.permute.xlu0 %294 }
  0xd0   :  { %v303_v37 = vsel %vm302_vm14, %v295_v32, %v297_v29  ;;  %v366_v14 = vsel %vm335_vm15, %v362_v33, %v304_v31  ;;  %v332_v31 = vsel %vm330_vm13, %v327_v20, %v160_v21  ;;  %v70_v20 = vld [vmem:[%s2948_s9 + $0xd0] sm:$0xff]  ;;  %v2384_v21 = vld [vmem:[%s2948_s9 + $0x40] sm:$0xff]  ;;  %vm691_vm13 = vcmask 547840  }
  0xd1   :  { %415 = vrot.lane.b32.xlu1 %v366_v14, %s1972_s29  ;;  %v365_v40 = vsel %vm335_vm15, %v361_v38, %v303_v37 }
  0xd2   :  { %413 = vrot.lane.b32.xlu0 %v365_v40, %s1972_s29 }
  0xd6   :  { %v1697_v57 = vpop.permute.xlu1 %1696 }
  0xd7   :  { %v1692_v63 = vpop.permute.xlu0 %1691  ;;  %v1699_v8 = vunpack.i.h.bf16 %v1697_v57  ;;  %v1698_v9 = vunpack.i.l.bf16 %v1697_v57 }
  0xd8   :  { %v1694_v10 = vunpack.i.h.bf16 %v1692_v63  ;;  %v1693_v12 = vunpack.i.l.bf16 %v1692_v63 }
  0xd9   :  { %419 = vrot.lane.b32.xlu1 %v368_v2, %s1972_s29  ;;  %v177_v23 = vsel %vm174_vm2, %v1698_v9, %v1699_v8  ;;  %v339_v32 = vsel %vm335_vm15, %v334_v58, %v1699_v8  ;;  %v2311_v2 = vld [vmem:[%s2948_s9 + $0x70] sm:$0xff]  ;;  %v2394_v58 = vld [vmem:[%s2948_s9 + $0x38] sm:$0xff] }
  0xda   :  { %417 = vrot.lane.b32.xlu0 %v367_v7, %s1972_s29  ;;  %v175_v24 = vsel %vm174_vm2, %v1693_v12, %v1694_v10  ;;  %v176_v28 = vsel %vm174_vm2, %v1694_v10, %v1698_v9  ;;  %v338_v38 = vsel %vm335_vm15, %v333_v35, %v177_v23  ;;  %v370_v7 = vld [vmem:[%s2947_s1 + $0x8] sm:$0xff]  ;;  %549 = vmatpush.msra.mxu3 %v2311_v2  ;;  %v68_v23 = vld [vmem:[%s2948_s9 + $0xc0] sm:$0xff] }
  0xdb   :  { %v336_v14 = vsel %vm335_vm15, %v331_v27, %v175_v24  ;;  %v337_v42 = vsel %vm335_vm15, %v332_v31, %v176_v28  ;;  %v2332_v10 = vld [vmem:[%s2948_s9 + $0x68] sm:$0xff]  ;;  %v2404_v24 = vld [vmem:[%s2948_s9 + $0x30] sm:$0xff]  ;;  %v2421_v28 = vld [vmem:[%s2948_s9 + $0xb8] sm:$0xff] }
  0xdc   :  { %v73_v12 = vld [vmem:[%s2948_s9 + $0xe8] sm:$0xff]  ;;  %550 = vmatpush.msra.mxu3 %v2332_v10  ;;  %v2459_v31 = vld [vmem:[%s2948_s9 + $0xb0] sm:$0xff] }
  0xdd   :  { %v69_v35 = vld [vmem:[%s2948_s9 + $0xc8] sm:$0xff] }
  0xde   :  { %v1707_v26 = vpop.permute.xlu1 %1706  ;;  %551 = vmatpush.msra.mxu3 %v2342_v11  ;;  %v2414_v27 = vld [vmem:[%s2948_s9 + $0x28] sm:$0xff] }
  0xdf   :  { %v1709_v22 = vunpack.i.h.bf16 %v1707_v26  ;;  %v1708_v29 = vunpack.i.l.bf16 %v1707_v26  ;;  %v1702_v30 = vpop.permute.xlu0 %1701  ;;  %v372_v26 = vld [vmem:[%s2947_s1 + $0x18] sm:$0xff] }
  0xe0   :  { %v1704_v33 = vunpack.i.h.bf16 %v1702_v30  ;;  %v1703_v34 = vunpack.i.l.bf16 %v1702_v30  ;;  %552 = vmatpush.msra.mxu3 %v2352_v15  ;;  %v2443_v30 = vld [vmem:[%s2948_s9 + $0x10] sm:$0xff] }
  0xe1   :  { %v193_v37 = vsel %vm190_vm5, %v1708_v29, %v1709_v22  ;;  %v344_v39 = vsel %vm340_vm6, %v339_v32, %v1709_v22  ;;  %384 = vperm.xlu1 %1721, %v374_v49   ;;  %v2428_v22 = vld [vmem:[%s2948_s9 + $0x20] sm:$0xff]  ;;  %v2465_v32 = vld [vmem:[%s2948_s9 + $0x8] sm:$0xff] }
  0xe2   :  { %v192_v40 = vsel %vm190_vm5, %v1704_v33, %v1708_v29  ;;  %v191_v41 = vsel %vm190_vm5, %v1703_v34, %v1704_v33  ;;  %v343_v43 = vsel %vm340_vm6, %v338_v38, %v193_v37  ;;  %379 = vperm.xlu0 %1720, %v373_v36   ;;  %553 = vmatpush.msra.mxu3 %v2362_v17  ;;  %v2435_v29 = vld [vmem:[%s2948_s9 + $0x18] sm:$0xff]  ;;  %v2470_v33 = vld [vmem:[%s2948_s9 + $0xa8] sm:$0xff]  ;;  %v2477_v34 = vld [vmem:[%s2948_s9] sm:$0xff]  ;;  %vm1398_vm5 = vcmask 416768  }
  0xe3   :  { %v341_v25 = vsel %vm340_vm6, %v336_v14, %v191_v41  ;;  %v342_v45 = vsel %vm340_vm6, %v337_v42, %v192_v40  ;;  %v1715_v46 = vpack.i.bf16 %v344_v39, %v343_v43  ;;  %v2482_v37 = vld [vmem:[%s2948_s9 + $0xa0] sm:$0xff]  ;;  %v2490_v14 = vld [vmem:[%s2948_s9 + $0x98] sm:$0xff]  ;;  %v2497_v38 = vld [vmem:[%s2948_s9 + $0x90] sm:$0xff] }
  0xe4   :  { %v1710_v47 = vpack.i.bf16 %v342_v45, %v341_v25  ;;  %554 = vmatpush.msra.mxu3 %v2372_v19  ;;  %v2503_v39 = vld [vmem:[%s2948_s9 + $0x88] sm:$0xff]  ;;  %v2509_v40 = vld [vmem:[%s2948_s9 + $0x80] sm:$0xff] }
  0xe6   :  { %1711 = vrot.lane.b32.xlu2 %v1710_v47, %s1972_s29  ;;  %555 = vmatpush.msra.mxu3 %v2384_v21 }
  0xe8   :  { %556 = vmatpush.msra.mxu3 %v2394_v58 }
  0xe9   :  { %394 = vperm.xlu1 %1721, %v376_v59  }
  0xea   :  { %557 = vmatpush.msra.mxu3 %v2404_v24 }
  0xec   :  { %558 = vmatpush.msra.mxu3 %v2414_v27 }
  0xee   :  { %1716 = vrot.lane.b32.xlu2 %v1715_v46, %s1972_s29  ;;  %559 = vmatpush.msra.mxu3 %v2428_v22 }
  0xf0   :  { %560 = vmatpush.msra.mxu3 %v2435_v29 }
  0xf2   :  { %561 = vmatpush.msra.mxu3 %v2443_v30 }
  0xf4   :  { %562 = vmatpush.msra.mxu3 %v2465_v32 }
  0xf6   :  { %389 = vperm.xlu2 %1722, %v375_v60   ;;  %563 = vmatpush.msra.mxu3 %v2477_v34 }
 0x140   :  { %v1712_v50 = vpop.permute.xlu2 %1711 }
 0x141   :  { %v1714_v51 = vunpack.i.h.bf16 %v1712_v50  ;;  %v1713_v52 = vunpack.i.l.bf16 %v1712_v50 }
 0x143   :  { %v416_v53 = vpop.permute.xlu1 %415  ;;  %v421_v44 = vsel %vm94_vm4, %v1713_v52, %v1714_v51 }
 0x144   :  { %v414_v54 = vpop.permute.xlu0 %413 }
 0x145   :  { %v424_v56 = vsel %vm94_vm4, %v414_v54, %v416_v53 }
 0x146   :  { %1567 = vmatpush.msk.msra.mxu0 %vm340_vm6, %v424_v56 }
 0x148   :  { %v1717_v57 = vpop.permute.xlu2 %1716  ;;  %464 = vmatpush.msra.mxu0 %v421_v44 }
 0x149   :  { %1568 = vmatmul.msk.f32.vlgmr.msra.gmra.mxu0 %vm430_vm7, %v369_v55  ;;  %v1719_v62 = vunpack.i.h.bf16 %v1717_v57  ;;  %v1718_v63 = vunpack.i.l.bf16 %v1717_v57 }
 0x14a   :  { %577 = vmatpush.msrb.mxu0 %v75_v3 }
 0x14b   :  { %v420_v0 = vpop.permute.xlu1 %419  ;;  %v422_v8 = vsel %vm94_vm4, %v1714_v51, %v1718_v63  ;;  %v423_v9 = vsel %vm94_vm4, %v1718_v63, %v1719_v62 }
 0x14c   :  { %v418_v1 = vpop.permute.xlu0 %417  ;;  %578 = vmatpush.msrb.mxu0 %v74_v6 }
 0x14d   :  { %v425_v4 = vsel %vm94_vm4, %v416_v53, %v418_v1  ;;  %v426_v5 = vsel %vm94_vm4, %v418_v1, %v420_v0 }
 0x14e   :  { %1572 = vmatpush.msk.msra.mxu1 %vm340_vm6, %v425_v4  ;;  %1577 = vmatpush.msk.msra.mxu2 %vm340_vm6, %v426_v5  ;;  %vm1531_vm6 = vcmask 392192  }
 0x14f   :  { %579 = vmatpush.msrb.mxu0 %v73_v12 }
 0x150   :  { %493 = vmatpush.msra.mxu1 %v422_v8  ;;  %522 = vmatpush.msra.mxu2 %v423_v9  ;;  %v390_v52 = vpop.permute.xlu2 %389 }
 0x151   :  { %1569 = vmatmul.msk.f32.gmra.mxu0 %vm430_vm7, %v370_v7  ;;  %1573 = vmatmul.msk.f32.vlgmr.msra.gmra.mxu1 %vm430_vm7, %v369_v55 }
 0x152   :  { %1578 = vmatmul.msk.f32.vlgmr.msra.gmra.mxu2 %vm430_vm7, %v369_v55  ;;  %606 = vmatpush.msrb.mxu1 %v2305_v61 }
 0x153   :  { %580 = vmatpush.msrb.mxu0 %v72_v13  ;;  %v385_v45 = vpop.permute.xlu1 %384 }
 0x154   :  { %607 = vmatpush.msrb.mxu1 %v2311_v2  ;;  %v380_v41 = vpop.permute.xlu0 %379 }
 0x155   :  { %581 = vmatpush.msrb.mxu0 %v71_v16 }
 0x156   :  { %608 = vmatpush.msrb.mxu1 %v2332_v10 }
 0x157   :  { %582 = vmatpush.msrb.mxu0 %v70_v20 }
 0x158   :  { %609 = vmatpush.msrb.mxu1 %v2342_v11 }
 0x159   :  { %1570 = vmatmul.msk.f32.gmra.mxu0 %vm430_vm7, %v371_v18  ;;  %1574 = vmatmul.msk.f32.gmra.mxu1 %vm430_vm7, %v370_v7 }
 0x15a   :  { %1579 = vmatmul.msk.f32.gmra.mxu2 %vm430_vm7, %v370_v7  ;;  %583 = vmatpush.msrb.mxu0 %v69_v35 }
 0x15b   :  { %610 = vmatpush.msrb.mxu1 %v2352_v15  ;;  %v395_v63 = vpop.permute.xlu1 %394 }
 0x15c   :  { %584 = vmatpush.msrb.mxu0 %v68_v23 }
 0x15d   :  { %611 = vmatpush.msrb.mxu1 %v2362_v17 }
 0x15e   :  { %585 = vmatpush.msrb.mxu0 %v2421_v28 }
 0x15f   :  { %612 = vmatpush.msrb.mxu1 %v2372_v19 }
 0x160   :  { %586 = vmatpush.msrb.mxu0 %v2459_v31 }
 0x161   :  { %1571 = vmatmul.msk.f32.gmra.mxu0 %vm430_vm7, %v372_v26  ;;  %1575 = vmatmul.msk.f32.gmra.mxu1 %vm430_vm7, %v371_v18 }
 0x162   :  { %1580 = vmatmul.msk.f32.gmra.mxu2 %vm430_vm7, %v371_v18  ;;  %613 = vmatpush.msrb.mxu1 %v2384_v21 }
 0x163   :  { %587 = vmatpush.msrb.mxu0 %v2470_v33 }
 0x164   :  { %614 = vmatpush.msrb.mxu1 %v2394_v58 }
 0x165   :  { %588 = vmatpush.msrb.mxu0 %v2482_v37 }
 0x166   :  { %615 = vmatpush.msrb.mxu1 %v2404_v24 }
 0x167   :  { %589 = vmatpush.msrb.mxu0 %v2490_v14 }
 0x168   :  { %616 = vmatpush.msrb.mxu1 %v2414_v27 }
 0x169   :  { %1576 = vmatmul.msk.f32.gmra.mxu1 %vm430_vm7, %v372_v26  ;;  %590 = vmatpush.msrb.mxu0 %v2497_v38 }
 0x16a   :  { %1581 = vmatmul.msk.f32.gmra.mxu2 %vm430_vm7, %v372_v26  ;;  %617 = vmatpush.msrb.mxu1 %v2428_v22  ;;  %vm1559_vm7 = vcmask 64512  }
 0x16b   :  { %591 = vmatpush.msrb.mxu0 %v2503_v39 }
 0x16c   :  { %618 = vmatpush.msrb.mxu1 %v2435_v29 }
 0x16d   :  { %592 = vmatpush.msrb.mxu0 %v2509_v40 }
 0x16e   :  { %619 = vmatpush.msrb.mxu1 %v2443_v30 }
 0x170   :  { %620 = vmatpush.msrb.mxu1 %v2465_v32 }
 0x172   :  { %621 = vmatpush.msrb.mxu1 %v2477_v34 }
 0x1c6   :  { %v466_v42 = vpop.f32.mrf.mxu0 }
 0x1c7   :  { %v467_v43 = vadd.f32 %v466_v42, %v380_v41 }
 0x1c9   :  { %v536_v25 = vmax.f32 %v467_v43, 0.0  ;;  %v635_v43 = vld [vmem:[%s2949_s10] sm:$0x3] }
 0x1ca   :  { %vm636_vm8 = vcmp.gt.f32.partialorder %v635_v43, 0.5 }
 0x1cb   :  { %564 = vmatmul.f32.vlgmr.msra.gmra.mxu3 %v536_v25 }
 0x1ce   :  { %v469_v46 = vpop.f32.mrf.mxu0  ;;  %v495_v47 = vpop.f32.mrf.mxu1 }
 0x1cf   :  { %v470_v36 = vadd.f32 %v469_v46, %v385_v45  ;;  %v496_v49 = vadd.f32 %v495_v47, %v380_v41 }
 0x1d1   :  { %v539_v50 = vmax.f32 %v470_v36, 0.0  ;;  %v537_v51 = vmax.f32 %v496_v49, 0.0 }
 0x1d3   :  { %567 = vmatmul.f32.gmra.mxu3 %v539_v50  ;;  %593 = vmatmul.f32.vlgmr.msrb.gmra.mxu0 %v537_v51 }
 0x1d5   :  { %v524_v53 = vpop.f32.mrf.mxu2 }
 0x1d6   :  { %v525_v54 = vadd.f32 %v524_v53, %v380_v41  ;;  %v472_v56 = vpop.f32.mrf.mxu0  ;;  %v498_v55 = vpop.f32.mrf.mxu1 }
 0x1d7   :  { %v473_v44 = vadd.f32 %v472_v56, %v390_v52  ;;  %v499_v57 = vadd.f32 %v498_v55, %v385_v45 }
 0x1d8   :  { %v538_v59 = vmax.f32 %v525_v54, 0.0 }
 0x1d9   :  { %v542_v60 = vmax.f32 %v473_v44, 0.0  ;;  %v540_v62 = vmax.f32 %v499_v57, 0.0 }
 0x1da   :  { %622 = vmatmul.f32.vlgmr.msrb.gmra.mxu1 %v538_v59  ;;  %v880_v59 = vld [vmem:[%s2950_s4] sm:$0xff] }
 0x1db   :  { %570 = vmatmul.f32.gmra.mxu3 %v542_v60  ;;  %596 = vmatmul.f32.gmra.mxu0 %v540_v62 }
 0x1dd   :  { %v527_v0 = vpop.f32.mrf.mxu2 }
 0x1de   :  { %v528_v1 = vadd.f32 %v527_v0, %v385_v45  ;;  %v475_v3 = vpop.f32.mrf.mxu0  ;;  %v501_v4 = vpop.f32.mrf.mxu1  ;;  %v637_v45 = vsel %vm636_vm8, 1, %v1983_v48  ;;  %vm1561_vm8 = vcmask 130048  }
 0x1df   :  { %v476_v5 = vadd.f32 %v475_v3, %v395_v63  ;;  %v502_v6 = vadd.f32 %v501_v4, %v390_v52  ;;  %v638_v47 = vperm.slane %v637_v45, 0  ;;  %v639_v44 = vperm.slane %v637_v45, 1 }
 0x1e0   :  { %v541_v7 = vmax.f32 %v528_v1, 0.0 }
 0x1e1   :  { %v545_v8 = vmax.f32 %v476_v5, 0.0  ;;  %v543_v9 = vmax.f32 %v502_v6, 0.0  ;;  %vm2516_vm9 = vcmp.eq.s32.totalorder %v638_v47, 1  ;;  %vm2526_vm10 = vcmp.eq.s32.totalorder %v639_v44, 1  ;;  %v881_v44 = vld [vmem:[%s2950_s4 + $0x8] sm:$0xff] }
 0x1e2   :  { %625 = vmatmul.f32.gmra.mxu1 %v541_v7 }
 0x1e3   :  { %573 = vmatmul.f32.gmra.mxu3 %v545_v8  ;;  %599 = vmatmul.f32.gmra.mxu0 %v543_v9 }
 0x1e5   :  { %v530_v12 = vpop.f32.mrf.mxu2 }
 0x1e6   :  { %v531_v13 = vadd.f32 %v530_v12, %v390_v52  ;;  %v504_v16 = vpop.f32.mrf.mxu1 }
 0x1e7   :  { %v505_v18 = vadd.f32 %v504_v16, %v395_v63 }
 0x1e8   :  { %v544_v20 = vmax.f32 %v531_v13, 0.0 }
 0x1e9   :  { %v546_v35 = vmax.f32 %v505_v18, 0.0 }
 0x1ea   :  { %628 = vmatmul.f32.gmra.mxu1 %v544_v20 }
 0x1eb   :  { %602 = vmatmul.f32.gmra.mxu0 %v546_v35 }
 0x1ed   :  { %v533_v23 = vpop.f32.mrf.mxu2 }
 0x1ee   :  { %v534_v26 = vadd.f32 %v533_v23, %v395_v63 }
 0x1f0   :  { %v547_v41 = vmax.f32 %v534_v26, 0.0 }
 0x1f2   :  { %631 = vmatmul.f32.gmra.mxu1 %v547_v41 }
 0x24e   :  { %v565_v42 = vpop.f32.mrf.mxu3 }
 0x250   :  { %v594_v25 = vpop.f32.mrf.mxu0 }
 0x251   :  { %v595_v7 = vadd.f32 %v594_v25, %v565_v42 }
 0x253   :  { %v642_v9 = vsel %vm2516_vm9, %v595_v7, 0.0 }
 0x256   :  { %v568_v46 = vpop.f32.mrf.mxu3 }
 0x257   :  { %v623_v36 = vpop.f32.mrf.mxu1 }
 0x258   :  { %v597_v49 = vpop.f32.mrf.mxu0  ;;  %v643_v8 = vsel %vm2526_vm10, %v623_v36, 0.0 }
 0x259   :  { %v598_v50 = vadd.f32 %v597_v49, %v568_v46 }
 0x25b   :  { %v644_v52 = vsel %vm2516_vm9, %v598_v50, 0.0 }
 0x25c   :  { %662 = vrot.lane.b32.xlu0 %v644_v52, %s1984_s2 }
 0x25e   :  { %v571_v54 = vpop.f32.mrf.mxu3 }
 0x25f   :  { %v626_v53 = vpop.f32.mrf.mxu1 }
 0x260   :  { %v600_v56 = vpop.f32.mrf.mxu0  ;;  %v645_v0 = vsel %vm2526_vm10, %v626_v53, 0.0 }
 0x261   :  { %v601_v55 = vadd.f32 %v600_v56, %v571_v54 }
 0x263   :  { %v646_v57 = vsel %vm2516_vm9, %v601_v55, 0.0 }
 0x264   :  { %666 = vrot.lane.b32.xlu1 %v646_v57, %s1984_s2  ;;  %v882_v57 = vld [vmem:[%s2950_s4 + $0x10] sm:$0xff] }
 0x266   :  { %v574_v1 = vpop.f32.mrf.mxu3 }
 0x267   :  { %v629_v60 = vpop.f32.mrf.mxu1 }
 0x268   :  { %v647_v62 = vsel %vm2526_vm10, %v629_v60, 0.0  ;;  %v603_v63 = vpop.f32.mrf.mxu0  ;;  %v883_v60 = vld [vmem:[%s2950_s4 + $0x18] sm:$0xff] }
 0x269   :  { %668 = vrot.lane.b32.xlu2 %v647_v62, %s1984_s2  ;;  %v604_v3 = vadd.f32 %v603_v63, %v574_v1 }
 0x26b   :  { %v648_v6 = vsel %vm2516_vm9, %v604_v3, 0.0 }
 0x26c   :  { %664 = vrot.lane.b32.xlu1 %v645_v0, %s1984_s2 }
 0x26f   :  { %v632_v4 = vpop.f32.mrf.mxu1 }
 0x270   :  { %v649_v5 = vsel %vm2526_vm10, %v632_v4, 0.0 }
 0x271   :  { %672 = vrot.lane.b32.xlu0 %v649_v5, %s1984_s2  ;;  %670 = vrot.lane.b32.xlu2 %v648_v6, %s1984_s2 }
 0x279   :  { %660 = vrot.lane.b32.xlu0 %v643_v8, %s1984_s2  ;;  %658 = vrot.lane.b32.xlu2 %v642_v9, %s1984_s2 }
 0x2c3   :  { %v669_v12 = vpop.permute.xlu2 %668 }
 0x2cb   :  { %v2556_v35 = vpop.permute.xlu2 %670 }
 0x2cc   :  { %v690_v56 = vsel %vm674_vm12, 0.0, %v2556_v35 }
 0x2ce   :  { %v2550_v16 = vpop.permute.xlu0 %662 }
 0x2cf   :  { %v688_v23 = vsel %vm674_vm12, 0.0, %v2550_v16 }
 0x2d3   :  { %v2572_v47 = vpop.permute.xlu2 %658 }
 0x2d4   :  { %v687_v50 = vsel %vm674_vm12, 0.0, %v2572_v47 }
 0x2d6   :  { %v2548_v13 = vpop.permute.xlu1 %666 }
 0x2d7   :  { %v2564_v42 = vsel %vm674_vm12, %v2548_v13, %v669_v12  ;;  %v689_v25 = vsel %vm674_vm12, 0.0, %v2548_v13 }
 0x2d8   :  { %v694_v45 = vsel %vm691_vm13, %v2564_v42, 0.0 }
 0x2d9   :  { %v1758_v46 = vpack.i.bf16 %v694_v45, %v689_v25 }
 0x2de   :  { %v665_v18 = vpop.permute.xlu1 %664 }
 0x2df   :  { %v2554_v20 = vsel %vm674_vm12, %v2550_v16, %v665_v18 }
 0x2e0   :  { %v693_v26 = vsel %vm691_vm13, %v2554_v20, 0.0 }
 0x2e1   :  { %v1738_v41 = vpack.i.bf16 %v693_v26, %v688_v23 }
 0x2e3   :  { %v673_v43 = vpop.permute.xlu0 %672  ;;  %1739 = vrot.lane.b32.xlu0 %v1738_v41, %s1975_s15  ;;  %1744 = vrot.lane.b32.xlu2 %v1738_v41, %s1973_s30 }
 0x2e4   :  { %v2590_v53 = vsel %vm674_vm12, %v2556_v35, %v673_v43 }
 0x2e5   :  { %v695_v54 = vsel %vm691_vm13, %v2590_v53, 0.0 }
 0x2e6   :  { %v1778_v55 = vpack.i.bf16 %v695_v54, %v690_v56 }
 0x2eb   :  { %v661_v36 = vpop.permute.xlu0 %660  ;;  %1759 = vrot.lane.b32.xlu0 %v1758_v46, %s1973_s30  ;;  %1749 = vrot.lane.b32.xlu2 %v1738_v41, %s1981_s21 }
 0x2ec   :  { %v2578_v49 = vsel %vm674_vm12, %v2572_v47, %v661_v36 }
 0x2ed   :  { %v692_v51 = vsel %vm691_vm13, %v2578_v49, 0.0 }
 0x2ee   :  { %v1723_v52 = vpack.i.bf16 %v692_v51, %v687_v50 }
 0x2f0   :  { %1724 = vrot.lane.b32.xlu1 %v1723_v52, %s1975_s15 }
 0x2f3   :  { %1764 = vrot.lane.b32.xlu0 %v1758_v46, %s1981_s21  ;;  %1754 = vrot.lane.b32.xlu2 %v1758_v46, %s1975_s15 }
 0x2f8   :  { %1729 = vrot.lane.b32.xlu1 %v1723_v52, %s1973_s30 }
 0x2fb   :  { %1769 = vrot.lane.b32.xlu2 %v1758_v46, %s1972_s29  ;;  %1799 = vrot.lane.b32.xlu0 %v1723_v52, %s1972_s29 }
 0x300   :  { %1734 = vrot.lane.b32.xlu1 %v1723_v52, %s1981_s21 }
 0x303   :  { %1779 = vrot.lane.b32.xlu2 %v1778_v55, %s1973_s30  ;;  %1824 = vrot.lane.b32.xlu0 %v1778_v55, %s1972_s29 }
 0x308   :  { %1774 = vrot.lane.b32.xlu1 %v1778_v55, %s1975_s15 }
 0x30b   :  { %1794 = vrot.lane.b32.xlu2 %v1758_v46, %s1979_s19  ;;  %1829 = vrot.lane.b32.xlu0 %v1778_v55, %s1979_s19 }
 0x310   :  { %1784 = vrot.lane.b32.xlu1 %v1778_v55, %s1981_s21 }
 0x313   :  { %1809 = vrot.lane.b32.xlu2 %v1723_v52, %s1979_s19  ;;  %1834 = vrot.lane.b32.xlu0 %v1778_v55, %s1977_s17 }
 0x318   :  { %1789 = vrot.lane.b32.xlu1 %v1738_v41, %s1972_s29 }
 0x31b   :  { %1819 = vrot.lane.b32.xlu2 %v1738_v41, %s1977_s17  ;;  %1839 = vrot.lane.b32.xlu0 %v1723_v52, %s1977_s17 }
 0x320   :  { %1804 = vrot.lane.b32.xlu1 %v1738_v41, %s1979_s19 }
 0x323   :  { %891 = vperm.xlu2 %1722, %v881_v44   ;;  %896 = vperm.xlu0 %1720, %v882_v57  }
 0x328   :  { %1814 = vrot.lane.b32.xlu1 %v1758_v46, %s1977_s17 }
 0x330   :  { %886 = vperm.xlu1 %1721, %v880_v59  }
 0x338   :  { %901 = vperm.xlu1 %1721, %v883_v60  }
 0x33d   :  { %v2624_v62 = vpop.permute.xlu2 %1744 }
 0x345   :  { %v2626_v0 = vpop.permute.xlu2 %1749 }
 0x34d   :  { %v1755_v4 = vpop.permute.xlu2 %1754 }
 0x34e   :  { %v1757_v23 = vunpack.i.h.bf16 %v1755_v4  ;;  %v1756_v26 = vunpack.i.l.bf16 %v1755_v4 }
 0x350   :  { %v778_v52 = vsel %vm126_vm11, %v1756_v26, %v1757_v23  ;;  %v1751_v26 = vunpack.i.l.bf16 %v2626_v0 }
 0x355   :  { %v1740_v63 = vpop.permute.xlu0 %1739  ;;  %v2630_v7 = vpop.permute.xlu2 %1769 }
 0x356   :  { %v1742_v45 = vunpack.i.h.bf16 %v1740_v63  ;;  %v1741_v46 = vunpack.i.l.bf16 %v1740_v63 }
 0x358   :  { %v777_v55 = vsel %vm126_vm11, %v1741_v46, %v1742_v45 }
 0x35d   :  { %v1760_v1 = vpop.permute.xlu0 %1759  ;;  %v1780_v12 = vpop.permute.xlu2 %1779 }
 0x35e   :  { %v1782_v54 = vunpack.i.h.bf16 %v1780_v12  ;;  %v1781_v56 = vunpack.i.l.bf16 %v1780_v12  ;;  %v1762_v44 = vunpack.i.h.bf16 %v1760_v1  ;;  %v1761_v57 = vunpack.i.l.bf16 %v1760_v1 }
 0x35f   :  { %v1752_v12 = vunpack.i.h.bf16 %v2626_v0 }
 0x360   :  { %v751_v1 = vsel %vm110_vm3, %v1781_v56, %v1782_v54  ;;  %v750_v46 = vsel %vm110_vm3, %v1761_v57, %v1762_v44 }
 0x362   :  { %v1725_v3 = vpop.permute.xlu1 %1724 }
 0x363   :  { %v1727_v50 = vunpack.i.h.bf16 %v1725_v3  ;;  %v1726_v51 = vunpack.i.l.bf16 %v1725_v3 }
 0x365   :  { %v1765_v5 = vpop.permute.xlu0 %1764  ;;  %v776_v3 = vsel %vm126_vm11, %v1726_v51, %v1727_v50 }
 0x366   :  { %v1767_v59 = vunpack.i.h.bf16 %v1765_v5  ;;  %v1766_v60 = vunpack.i.l.bf16 %v1765_v5 }
 0x36a   :  { %v2628_v6 = vpop.permute.xlu1 %1729 }
 0x36d   :  { %v2632_v8 = vpop.permute.xlu0 %1799 }
 0x372   :  { %v2634_v9 = vpop.permute.xlu1 %1734 }
 0x373   :  { %v1737_v0 = vunpack.i.h.bf16 %v2634_v9  ;;  %v1736_v51 = vunpack.i.l.bf16 %v2634_v9  ;;  %v1771_v9 = vunpack.i.l.bf16 %v2630_v7 }
 0x375   :  { %v2636_v25 = vpop.permute.xlu0 %1824 }
 0x376   :  { %v1827_v56 = vunpack.i.h.bf16 %v2636_v25 }
 0x37a   :  { %v1775_v18 = vpop.permute.xlu1 %1774 }
 0x37b   :  { %v1777_v41 = vunpack.i.h.bf16 %v1775_v18  ;;  %v1776_v43 = vunpack.i.l.bf16 %v1775_v18 }
 0x37d   :  { %975 = vmatpush.msra.mxu0 %v1777_v41  ;;  %v779_v36 = vsel %vm126_vm11, %v1776_v43, %v1777_v41  ;;  %v1747_v41 = vunpack.i.h.bf16 %v2624_v62  ;;  %v1795_v43 = vpop.permute.xlu2 %1794  ;;  %vm1041_vm11 = vcmask 523264  }
 0x37e   :  { %917 = vmatpush.msrb.mxu2 %v779_v36  ;;  %v862_v36 = vsel %vm174_vm2, %v1766_v60, %v1767_v59 }
 0x37f   :  { %976 = vmatpush.msra.mxu0 %v1757_v23  ;;  %v1746_v23 = vunpack.i.l.bf16 %v2624_v62  ;;  %v1732_v62 = vunpack.i.h.bf16 %v2628_v6 }
 0x380   :  { %918 = vmatpush.msrb.mxu2 %v778_v52 }
 0x381   :  { %977 = vmatpush.msra.mxu0 %v1742_v45  ;;  %v1830_v45 = vpop.permute.xlu0 %1829  ;;  %v749_v52 = vsel %vm110_vm3, %v1746_v23, %v1747_v41 }
 0x382   :  { %v1785_v63 = vpop.permute.xlu1 %1784  ;;  %919 = vmatpush.msrb.mxu2 %v777_v55  ;;  %v1826_v55 = vunpack.i.l.bf16 %v2636_v25  ;;  %v1832_v57 = vunpack.i.h.bf16 %v1830_v45  ;;  %v1831_v60 = vunpack.i.l.bf16 %v1830_v45 }
 0x383   :  { %v1787_v4 = vunpack.i.h.bf16 %v1785_v63  ;;  %v1786_v18 = vunpack.i.l.bf16 %v1785_v63  ;;  %978 = vmatpush.msra.mxu0 %v1727_v50  ;;  %v1731_v50 = vunpack.i.l.bf16 %v2628_v6  ;;  %v1772_v6 = vunpack.i.h.bf16 %v2630_v7 }
 0x384   :  { %920 = vmatpush.msrb.mxu2 %v776_v3  ;;  %v1796_v63 = vunpack.i.l.bf16 %v1795_v43  ;;  %v835_v7 = vsel %vm158_vm1, %v1831_v60, %v1832_v57 }
 0x385   :  { %979 = vmatpush.msra.mxu0 %v1782_v54  ;;  %1008 = vmatpush.msra.mxu1 %v1787_v4  ;;  %v863_v5 = vsel %vm174_vm2, %v1786_v18, %v1787_v4  ;;  %v861_v54 = vsel %vm174_vm2, %v1751_v26, %v1752_v12  ;;  %v748_v4 = vsel %vm110_vm3, %v1731_v50, %v1732_v62  ;;  %v1810_v23 = vpop.permute.xlu2 %1809  ;;  %v1801_v26 = vunpack.i.l.bf16 %v2632_v8  ;;  %vm2671_vm3 = vmneg %vm674_vm12 }
 0x386   :  { %921 = vmatpush.msrb.mxu2 %v751_v1  ;;  %950 = vmatpush.msrb.mxu3 %v863_v5  ;;  %v860_v18 = vsel %vm174_vm2, %v1736_v51, %v1737_v0 }
 0x387   :  { %980 = vmatpush.msra.mxu0 %v1762_v44  ;;  %1009 = vmatpush.msra.mxu1 %v1767_v59  ;;  %v1797_v59 = vunpack.i.h.bf16 %v1795_v43  ;;  %v722_v43 = vsel %vm94_vm4, %v1771_v9, %v1772_v6 }
 0x388   :  { %922 = vmatpush.msrb.mxu2 %v750_v46  ;;  %951 = vmatpush.msrb.mxu3 %v862_v36  ;;  %v1812_v46 = vunpack.i.h.bf16 %v1810_v23 }
 0x389   :  { %981 = vmatpush.msra.mxu0 %v1747_v41  ;;  %1010 = vmatpush.msra.mxu1 %v1752_v12  ;;  %v723_v41 = vsel %vm94_vm4, %v1826_v55, %v1827_v56  ;;  %v1802_v12 = vunpack.i.h.bf16 %v2632_v8  ;;  %v834_v1 = vsel %vm158_vm1, %v1796_v63, %v1797_v59  ;;  %v1835_v5 = vpop.permute.xlu0 %1834 }
 0x38a   :  { %v1790_v44 = vpop.permute.xlu1 %1789  ;;  %923 = vmatpush.msrb.mxu2 %v749_v52  ;;  %952 = vmatpush.msrb.mxu3 %v861_v54  ;;  %v1837_v52 = vunpack.i.h.bf16 %v1835_v5  ;;  %v1836_v54 = vunpack.i.l.bf16 %v1835_v5 }
 0x38b   :  { %982 = vmatpush.msra.mxu0 %v1732_v62  ;;  %1011 = vmatpush.msra.mxu1 %v1737_v0  ;;  %v1792_v25 = vunpack.i.h.bf16 %v1790_v44  ;;  %v1791_v3 = vunpack.i.l.bf16 %v1790_v44  ;;  %v1811_v62 = vunpack.i.l.bf16 %v1810_v23  ;;  %v720_v8 = vsel %vm94_vm4, %v1801_v26, %v1802_v12 }
 0x38c   :  { %924 = vmatpush.msrb.mxu2 %v748_v4  ;;  %953 = vmatpush.msrb.mxu3 %v860_v18  ;;  %v874_v4 = vld [vmem:[%s2951_s3 + $0x10] sm:$0xff] }
 0x38d   :  { %983 = vmatpush.msra.mxu0 %v1827_v56  ;;  %1012 = vmatpush.msra.mxu1 %v1832_v57  ;;  %v721_v45 = vsel %vm94_vm4, %v1791_v3, %v1792_v25  ;;  %v832_v55 = vsel %vm158_vm1, %v1811_v62, %v1812_v46  ;;  %v1820_v57 = vpop.permute.xlu2 %1819  ;;  %vm904_vm4 = vcmask 785408  }
 0x38e   :  { %925 = vmatpush.msrb.mxu2 %v723_v41  ;;  %954 = vmatpush.msrb.mxu3 %v835_v7 }
 0x38f   :  { %984 = vmatpush.msra.mxu0 %v1772_v6  ;;  %1013 = vmatpush.msra.mxu1 %v1797_v59  ;;  %v1822_v6 = vunpack.i.h.bf16 %v1820_v57 }
 0x390   :  { %926 = vmatpush.msrb.mxu2 %v722_v43  ;;  %955 = vmatpush.msrb.mxu3 %v834_v1 }
 0x391   :  { %985 = vmatpush.msra.mxu0 %v1792_v25 }
 0x392   :  { %v1805_v36 = vpop.permute.xlu1 %1804  ;;  %927 = vmatpush.msrb.mxu2 %v721_v45 }
 0x393   :  { %v1807_v50 = vunpack.i.h.bf16 %v1805_v36  ;;  %v1806_v0 = vunpack.i.l.bf16 %v1805_v36  ;;  %986 = vmatpush.msra.mxu0 %v1802_v12 }
 0x394   :  { %928 = vmatpush.msrb.mxu2 %v720_v8 }
 0x395   :  { %1594 = vmatpush.msk.msra.mxu0 %vm691_vm13, %v2590_v53  ;;  %1014 = vmatpush.msra.mxu1 %v1807_v50  ;;  %v833_v56 = vsel %vm158_vm1, %v1806_v0, %v1807_v50  ;;  %v807_v53 = vsel %vm142_vm0, %v1836_v54, %v1837_v52 }
 0x396   :  { %1583 = vmatpush.msk.msrb.mxu2 %vm2671_vm3, %v2556_v35  ;;  %956 = vmatpush.msrb.mxu3 %v833_v56  ;;  %v872_v35 = vld [vmem:[%s2951_s3] sm:$0xff] }
 0x397   :  { %1595 = vmatpush.msk.msra.mxu0 %vm691_vm13, %v2564_v42  ;;  %1015 = vmatpush.msra.mxu1 %v1812_v46  ;;  %v1840_v42 = vpop.permute.xlu0 %1839 }
 0x398   :  { %1585 = vmatpush.msk.msrb.mxu2 %vm2671_vm3, %v2548_v13  ;;  %957 = vmatpush.msrb.mxu3 %v832_v55  ;;  %v1821_v13 = vunpack.i.l.bf16 %v1820_v57  ;;  %v1841_v59 = vunpack.i.l.bf16 %v1840_v42 }
 0x399   :  { %1596 = vmatpush.msk.msra.mxu0 %vm691_vm13, %v2554_v20  ;;  %1016 = vmatpush.msra.mxu1 %v1837_v52  ;;  %v1842_v20 = vunpack.i.h.bf16 %v1840_v42  ;;  %v1112_v42 = vld [vmem:[%s2952_s11] sm:$0x1] }
 0x39a   :  { %v1815_v60 = vpop.permute.xlu1 %1814  ;;  %1587 = vmatpush.msk.msrb.mxu2 %vm2671_vm3, %v2550_v16  ;;  %958 = vmatpush.msrb.mxu3 %v807_v53  ;;  %v805_v16 = vsel %vm142_vm0, %v1821_v13, %v1822_v6  ;;  %vm1113_vm14 = vcmp.gt.f32.partialorder %v1112_v42, 0.5 }
 0x39b   :  { %v1817_v9 = vunpack.i.h.bf16 %v1815_v60  ;;  %v1816_v44 = vunpack.i.l.bf16 %v1815_v60  ;;  %1597 = vmatpush.msk.msra.mxu0 %vm691_vm13, %v2578_v49  ;;  %v873_v49 = vld [vmem:[%s2951_s3 + $0x8] sm:$0xff] }
 0x39c   :  { %1589 = vmatpush.msk.msrb.mxu2 %vm2671_vm3, %v2572_v47  ;;  %991 = vmatmul.f32.vlgmr.msra.gmra.mxu0 %v872_v35  ;;  %v804_v47 = vsel %vm142_vm0, %v1841_v59, %v1842_v20 }
 0x39d   :  { %933 = vmatmul.f32.vlgmr.msrb.gmra.mxu2 %v872_v35  ;;  %1017 = vmatpush.msra.mxu1 %v1817_v9  ;;  %v806_v63 = vsel %vm142_vm0, %v1816_v44, %v1817_v9  ;;  %vm1141_vm0 = vcmask 809984  }
 0x39e   :  { %959 = vmatpush.msrb.mxu3 %v806_v63  ;;  %1054 = vmatpush.msra.mxu2 %v2305_v61  ;;  %v875_v61 = vld [vmem:[%s2951_s3 + $0x18] sm:$0xff] }
 0x39f   :  { %1018 = vmatpush.msra.mxu1 %v1822_v6  ;;  %v897_v18 = vpop.permute.xlu0 %896  ;;  %v1114_v6 = vsel %vm1113_vm14, 1, %v1983_v48 }
 0x3a0   :  { %960 = vmatpush.msrb.mxu3 %v805_v16  ;;  %1055 = vmatpush.msra.mxu2 %v2311_v2  ;;  %v876_v2 = vld [vmem:[%s2951_s3 + $0x20] sm:$0xff]  ;;  %v1115_v9 = vperm.slane %v1114_v6, 0 }
 0x3a1   :  { %1019 = vmatpush.msra.mxu1 %v1842_v20 }
 0x3a2   :  { %961 = vmatpush.msrb.mxu3 %v804_v47  ;;  %1598 = vmatmul.msk.f32.vlgmr.msra.gmra.mxu1 %vm904_vm4, %v873_v49  ;;  %vm1116_vm15 = vcmp.eq.s32.totalorder %v1115_v9, 1 }
 0x3a3   :  { %1590 = vmatmul.msk.f32.vlgmr.msrb.gmra.mxu3 %vm904_vm4, %v873_v49  ;;  %1056 = vmatpush.msra.mxu2 %v2332_v10  ;;  %v877_v10 = vld [vmem:[%s2951_s3 + $0x28] sm:$0xff] }
 0x3a4   :  { %994 = vmatmul.f32.gmra.mxu0 %v874_v4  ;;  %1091 = vmatpush.msra.mxu3 %v2421_v28  ;;  %v879_v28 = vld [vmem:[%s2951_s3 + $0x38] sm:$0xff] }
 0x3a5   :  { %936 = vmatmul.f32.gmra.mxu2 %v874_v4 }
 0x3a6   :  { %1057 = vmatpush.msra.mxu2 %v2342_v11  ;;  %1092 = vmatpush.msra.mxu3 %v2459_v31  ;;  %v878_v11 = vld [vmem:[%s2951_s3 + $0x30] sm:$0xff] }
 0x3a8   :  { %1058 = vmatpush.msra.mxu2 %v2352_v15  ;;  %1093 = vmatpush.msra.mxu3 %v2470_v33 }
 0x3aa   :  { %1599 = vmatmul.msk.f32.gmra.mxu1 %vm904_vm4, %v875_v61  ;;  %1059 = vmatpush.msra.mxu2 %v2362_v17 }
 0x3ab   :  { %1591 = vmatmul.msk.f32.gmra.mxu3 %vm904_vm4, %v875_v61 }
 0x3ac   :  { %997 = vmatmul.f32.gmra.mxu0 %v876_v2  ;;  %1060 = vmatpush.msra.mxu2 %v2372_v19 }
 0x3ad   :  { %939 = vmatmul.f32.gmra.mxu2 %v876_v2  ;;  %1094 = vmatpush.msra.mxu3 %v2482_v37 }
 0x3ae   :  { %1061 = vmatpush.msra.mxu2 %v2384_v21 }
 0x3af   :  { %1095 = vmatpush.msra.mxu3 %v2490_v14 }
 0x3b0   :  { %1062 = vmatpush.msra.mxu2 %v2394_v58 }
 0x3b1   :  { %1096 = vmatpush.msra.mxu3 %v2497_v38 }
 0x3b2   :  { %1600 = vmatmul.msk.f32.gmra.mxu1 %vm904_vm4, %v877_v10  ;;  %1063 = vmatpush.msra.mxu2 %v2404_v24 }
 0x3b3   :  { %1592 = vmatmul.msk.f32.gmra.mxu3 %vm904_vm4, %v877_v10 }
 0x3b4   :  { %1000 = vmatmul.f32.gmra.mxu0 %v878_v11  ;;  %1064 = vmatpush.msra.mxu2 %v2414_v27 }
 0x3b5   :  { %942 = vmatmul.f32.gmra.mxu2 %v878_v11  ;;  %1097 = vmatpush.msra.mxu3 %v2503_v39 }
 0x3b6   :  { %1065 = vmatpush.msra.mxu2 %v2428_v22 }
 0x3b7   :  { %1098 = vmatpush.msra.mxu3 %v2509_v40 }
 0x3b8   :  { %1066 = vmatpush.msra.mxu2 %v2435_v29 }
 0x3ba   :  { %1601 = vmatmul.msk.f32.gmra.mxu1 %vm904_vm4, %v879_v28  ;;  %1067 = vmatpush.msra.mxu2 %v2443_v30 }
 0x3bb   :  { %1593 = vmatmul.msk.f32.gmra.mxu3 %vm904_vm4, %v879_v28 }
 0x3bc   :  { %1068 = vmatpush.msra.mxu2 %v2465_v32 }
 0x3be   :  { %1069 = vmatpush.msra.mxu2 %v2477_v34 }
 0x3c0   :  { %1344 = vmatpush.msrb.mxu2 %v2352_v15 }
 0x3c2   :  { %1345 = vmatpush.msrb.mxu2 %v2362_v17  ;;  %v887_v17 = vpop.permute.xlu1 %886 }
 0x3c4   :  { %1346 = vmatpush.msrb.mxu2 %v2372_v19 }
 0x3c6   :  { %1347 = vmatpush.msrb.mxu2 %v2384_v21 }
 0x3c8   :  { %1348 = vmatpush.msrb.mxu2 %v2394_v58 }
 0x3ca   :  { %1349 = vmatpush.msrb.mxu2 %v2404_v24  ;;  %v902_v45 = vpop.permute.xlu1 %901 }
 0x3cc   :  { %1350 = vmatpush.msrb.mxu2 %v2414_v27  ;;  %v892_v27 = vpop.permute.xlu2 %891 }
 0x3ce   :  { %1351 = vmatpush.msrb.mxu2 %v2428_v22 }
 0x3d0   :  { %1352 = vmatpush.msrb.mxu2 %v2435_v29 }
 0x3d2   :  { %1353 = vmatpush.msrb.mxu2 %v2443_v30 }
 0x3d4   :  { %1354 = vmatpush.msrb.mxu2 %v2465_v32 }
 0x3d6   :  { %1355 = vmatpush.msrb.mxu2 %v2477_v34 }
 0x419   :  { %v992_v15 = vpop.f32.mrf.mxu0 }
 0x41a   :  { %v993_v19 = vadd.f32 %v992_v15, %v887_v17 }
 0x41f   :  { %v1021_v21 = vpop.f32.mrf.mxu1 }
 0x420   :  { %v1022_v31 = vadd.f32 %v1021_v21, %v993_v19  ;;  %v934_v58 = vpop.f32.mrf.mxu2 }
 0x421   :  { %v995_v33 = vpop.f32.mrf.mxu0  ;;  %v935_v22 = vadd.f32 %v934_v58, %v887_v17 }
 0x422   :  { %v1034_v24 = vmax.f32 %v1022_v31, 0.0  ;;  %v996_v29 = vadd.f32 %v995_v33, %v892_v27 }
 0x424   :  { %1602 = vmatmul.msk.f32.vlgmr.msra.gmra.mxu3 %vm1041_vm11, %v1034_v24 }
 0x426   :  { %v963_v37 = vpop.f32.mrf.mxu3 }
 0x427   :  { %v964_v30 = vadd.f32 %v963_v37, %v935_v22  ;;  %v1024_v14 = vpop.f32.mrf.mxu1 }
 0x428   :  { %v1025_v32 = vadd.f32 %v1024_v14, %v996_v29  ;;  %v937_v38 = vpop.f32.mrf.mxu2 }
 0x429   :  { %v1033_v34 = vmax.f32 %v964_v30, 0.0  ;;  %v998_v39 = vpop.f32.mrf.mxu0  ;;  %v938_v25 = vadd.f32 %v937_v38, %v892_v27  ;;  %v1230_v38 = vld [vmem:[%s2953_s6] sm:$0xff] }
 0x42a   :  { %v1036_v40 = vmax.f32 %v1025_v32, 0.0  ;;  %v999_v3 = vadd.f32 %v998_v39, %v897_v18  ;;  %v1231_v32 = vld [vmem:[%s2953_s6 + $0x8] sm:$0xff]  ;;  %v1233_v39 = vld [vmem:[%s2953_s6 + $0x18] sm:$0xff] }
 0x42b   :  { %1070 = vmatmul.f32.vlgmr.msra.gmra.mxu2 %v1033_v34  ;;  %v1232_v34 = vld [vmem:[%s2953_s6 + $0x10] sm:$0xff] }
 0x42c   :  { %1603 = vmatmul.msk.f32.gmra.mxu3 %vm1041_vm11, %v1036_v40 }
 0x42e   :  { %v966_v41 = vpop.f32.mrf.mxu3 }
 0x42f   :  { %v967_v7 = vadd.f32 %v966_v41, %v938_v25  ;;  %v1027_v23 = vpop.f32.mrf.mxu1 }
 0x430   :  { %v1028_v12 = vadd.f32 %v1027_v23, %v999_v3  ;;  %v940_v26 = vpop.f32.mrf.mxu2 }
 0x431   :  { %v1035_v43 = vmax.f32 %v967_v7, 0.0  ;;  %v1001_v5 = vpop.f32.mrf.mxu0  ;;  %v941_v46 = vadd.f32 %v940_v26, %v897_v18 }
 0x432   :  { %v1038_v1 = vmax.f32 %v1028_v12, 0.0  ;;  %v1002_v36 = vadd.f32 %v1001_v5, %v902_v45 }
 0x433   :  { %1073 = vmatmul.f32.gmra.mxu2 %v1035_v43 }
 0x434   :  { %1604 = vmatmul.msk.f32.gmra.mxu3 %vm1041_vm11, %v1038_v1 }
 0x436   :  { %v969_v62 = vpop.f32.mrf.mxu3 }
 0x437   :  { %v970_v50 = vadd.f32 %v969_v62, %v941_v46  ;;  %v1030_v0 = vpop.f32.mrf.mxu1 }
 0x438   :  { %v1031_v8 = vadd.f32 %v1030_v0, %v1002_v36  ;;  %v943_v54 = vpop.f32.mrf.mxu2 }
 0x439   :  { %v1037_v51 = vmax.f32 %v970_v50, 0.0  ;;  %v944_v56 = vadd.f32 %v943_v54, %v902_v45 }
 0x43a   :  { %v1040_v52 = vmax.f32 %v1031_v8, 0.0 }
 0x43b   :  { %1076 = vmatmul.f32.gmra.mxu2 %v1037_v51 }
 0x43c   :  { %1605 = vmatmul.msk.f32.gmra.mxu3 %vm1041_vm11, %v1040_v52 }
 0x43e   :  { %v972_v55 = vpop.f32.mrf.mxu3 }
 0x43f   :  { %v973_v57 = vadd.f32 %v972_v55, %v944_v56 }
 0x441   :  { %v1039_v53 = vmax.f32 %v973_v57, 0.0 }
 0x443   :  { %1079 = vmatmul.f32.gmra.mxu2 %v1039_v53 }
 0x4a7   :  { %v1100_v35 = vpop.f32.mrf.mxu3 }
 0x4ae   :  { %v1071_v60 = vpop.f32.mrf.mxu2 }
 0x4af   :  { %v1103_v13 = vpop.f32.mrf.mxu3  ;;  %v1101_v11 = vadd.f32 %v1100_v35, %v1071_v60 }
 0x4b1   :  { %v1117_v28 = vsel %vm1116_vm15, %v1101_v11, 0.0  ;;  %v1966_v11 = vld [vmem:[%s2948_s9 + $0x10] sm:$0xff] }
 0x4b6   :  { %v1074_v44 = vpop.f32.mrf.mxu2 }
 0x4b7   :  { %v1104_v20 = vadd.f32 %v1103_v13, %v1074_v44  ;;  %v1106_v63 = vpop.f32.mrf.mxu3 }
 0x4b9   :  { %v1118_v59 = vsel %vm1116_vm15, %v1104_v20, 0.0 }
 0x4ba   :  { %1127 = vrot.lane.b32.xlu1 %v1118_v59, %s1984_s2  ;;  %v1222_v59 = vld [vmem:[%s2954_s5] sm:$0xff] }
 0x4be   :  { %v1077_v16 = vpop.f32.mrf.mxu2 }
 0x4bf   :  { %v1107_v49 = vadd.f32 %v1106_v63, %v1077_v16  ;;  %v1109_v4 = vpop.f32.mrf.mxu3 }
 0x4c1   :  { %v1119_v47 = vsel %vm1116_vm15, %v1107_v49, 0.0  ;;  %v1223_v49 = vld [vmem:[%s2954_s5 + $0x8] sm:$0xff] }
 0x4c2   :  { %1129 = vrot.lane.b32.xlu0 %v1119_v47, %s1984_s2  ;;  %v1224_v47 = vld [vmem:[%s2954_s5 + $0x10] sm:$0xff] }
 0x4c6   :  { %v1080_v61 = vpop.f32.mrf.mxu2 }
 0x4c7   :  { %v1110_v2 = vadd.f32 %v1109_v4, %v1080_v61  ;;  %v1963_v4 = vld [vmem:[%s2948_s9 + $0x28] sm:$0xff]  ;;  %v1964_v61 = vld [vmem:[%s2948_s9 + $0x20] sm:$0xff] }
 0x4c9   :  { %v1120_v10 = vsel %vm1116_vm15, %v1110_v2, 0.0  ;;  %v1225_v2 = vld [vmem:[%s2954_s5 + $0x18] sm:$0xff] }
 0x4ca   :  { %1131 = vrot.lane.b32.xlu2 %v1120_v10, %s1984_s2  ;;  %v1965_v10 = vld [vmem:[%s2948_s9 + $0x18] sm:$0xff] }
 0x4d2   :  { %1125 = vrot.lane.b32.xlu2 %v1117_v28, %s1984_s2  ;;  %v1226_v28 = vld [vmem:[%s2954_s5 + $0x20] sm:$0xff] }
 0x524   :  { %v1132_v15 = vpop.permute.xlu2 %1131 }
 0x525   :  { %v2793_v27 = vsel %vm674_vm12, 0.0, %v1132_v15  ;;  %v1967_v15 = vld [vmem:[%s2948_s9 + $0x8] sm:$0xff] }
 0x526   :  { %v1145_v37 = vsel %vm1141_vm0, %v2793_v27, 0.0 }
 0x52c   :  { %v1128_v17 = vpop.permute.xlu1 %1127  ;;  %v1126_v19 = vpop.permute.xlu2 %1125 }
 0x52d   :  { %v2782_v21 = vsel %vm674_vm12, 0.0, %v1128_v17  ;;  %v2785_v31 = vsel %vm674_vm12, 0.0, %v1126_v19  ;;  %v1968_v17 = vld [vmem:[%s2948_s9] sm:$0xff]  ;;  %v1227_v19 = vld [vmem:[%s2954_s5 + $0x28] sm:$0xff] }
 0x52e   :  { %v1143_v58 = vsel %vm1141_vm0, %v2782_v21, 0.0  ;;  %v1142_v33 = vsel %vm1141_vm0, %v2785_v31, 0.0 }
 0x52f   :  { %v1843_v24 = vpack.i.bf16 %v1142_v33, %v1143_v58 }
 0x531   :  { %1844 = vrot.lane.b32.xlu1 %v1843_v24, %s1975_s15 }
 0x534   :  { %v1130_v22 = vpop.permute.xlu0 %1129 }
 0x535   :  { %v2796_v29 = vsel %vm674_vm12, 0.0, %v1130_v22 }
 0x536   :  { %v1144_v30 = vsel %vm1141_vm0, %v2796_v29, 0.0 }
 0x537   :  { %v1858_v14 = vpack.i.bf16 %v1144_v30, %v1145_v37 }
 0x539   :  { %1859 = vrot.lane.b32.xlu2 %v1858_v14, %s1973_s30  ;;  %1854 = vrot.lane.b32.xlu0 %v1858_v14, %s1975_s15 }
 0x53a   :  { %1849 = vrot.lane.b32.xlu1 %v1843_v24, %s1973_s30 }
 0x541   :  { %1874 = vrot.lane.b32.xlu0 %v1858_v14, %s1981_s21  ;;  %1864 = vrot.lane.b32.xlu2 %v1843_v24, %s1981_s21 }
 0x542   :  { %1889 = vrot.lane.b32.xlu1 %v1858_v14, %s1979_s19 }
 0x549   :  { %1879 = vrot.lane.b32.xlu0 %v1858_v14, %s1972_s29  ;;  %1869 = vrot.lane.b32.xlu2 %v1843_v24, %s1972_s29 }
 0x54a   :  { %1894 = vrot.lane.b32.xlu1 %v1858_v14, %s1977_s17 }
 0x551   :  { %1884 = vrot.lane.b32.xlu0 %v1843_v24, %s1979_s19  ;;  %1899 = vrot.lane.b32.xlu2 %v1843_v24, %s1977_s17 }
 0x552   :  { %1241 = vperm.xlu1 %1721, %v1231_v32  }
 0x559   :  { %1236 = vperm.xlu0 %1720, %v1230_v38   ;;  %1246 = vperm.xlu2 %1722, %v1232_v34  }
 0x561   :  { %1251 = vperm.xlu0 %1720, %v1233_v39  }
 0x593   :  { %v1860_v18 = vpop.permute.xlu2 %1859 }
 0x594   :  { %v1861_v1 = vunpack.i.l.bf16 %v1860_v18  ;;  %v1862_v45 = vunpack.i.h.bf16 %v1860_v18 }
 0x59b   :  { %v1865_v26 = vpop.permute.xlu2 %1864 }
 0x59c   :  { %v1866_v36 = vunpack.i.l.bf16 %v1865_v26  ;;  %v1867_v0 = vunpack.i.h.bf16 %v1865_v26 }
 0x5a3   :  { %v1845_v40 = vpop.permute.xlu1 %1844  ;;  %v1870_v56 = vpop.permute.xlu2 %1869 }
 0x5a4   :  { %v1846_v23 = vunpack.i.l.bf16 %v1845_v40  ;;  %v1847_v12 = vunpack.i.h.bf16 %v1845_v40  ;;  %v1871_v53 = vunpack.i.l.bf16 %v1870_v56  ;;  %v1872_v35 = vunpack.i.h.bf16 %v1870_v56 }
 0x5ab   :  { %v1855_v25 = vpop.permute.xlu0 %1854  ;;  %v1900_v44 = vpop.permute.xlu2 %1899 }
 0x5ac   :  { %v1856_v3 = vunpack.i.l.bf16 %v1855_v25  ;;  %v1857_v41 = vunpack.i.h.bf16 %v1855_v25  ;;  %v1850_v7 = vpop.permute.xlu1 %1849  ;;  %v1901_v63 = vunpack.i.l.bf16 %v1900_v44  ;;  %v1902_v16 = vunpack.i.h.bf16 %v1900_v44 }
 0x5ad   :  { %v1851_v62 = vunpack.i.l.bf16 %v1850_v7  ;;  %v1852_v8 = vunpack.i.h.bf16 %v1850_v7 }
 0x5ae   :  { %1266 = vmatpush.msrb.mxu0 %v1856_v3 }
 0x5b0   :  { %1267 = vmatpush.msrb.mxu0 %v1857_v41 }
 0x5b2   :  { %1268 = vmatpush.msrb.mxu0 %v1846_v23 }
 0x5b3   :  { %v1875_v43 = vpop.permute.xlu0 %1874  ;;  %v1247_v40 = vpop.permute.xlu2 %1246 }
 0x5b4   :  { %v1876_v5 = vunpack.i.l.bf16 %v1875_v43  ;;  %1269 = vmatpush.msrb.mxu0 %v1847_v12  ;;  %v1877_v46 = vunpack.i.h.bf16 %v1875_v43  ;;  %v1890_v50 = vpop.permute.xlu1 %1889 }
 0x5b5   :  { %v1891_v52 = vunpack.i.l.bf16 %v1890_v50  ;;  %v1892_v55 = vunpack.i.h.bf16 %v1890_v50 }
 0x5b6   :  { %1270 = vmatpush.msrb.mxu0 %v1861_v1  ;;  %1299 = vmatpush.msrb.mxu1 %v1876_v5  ;;  %v1369_v5 = vld [vmem:[%s2955_s12] sm:$0x1] }
 0x5b7   :  { %vm1370_vm1 = vcmp.gt.f32.partialorder %v1369_v5, 0.5 }
 0x5b8   :  { %1271 = vmatpush.msrb.mxu0 %v1862_v45  ;;  %1300 = vmatpush.msrb.mxu1 %v1877_v46  ;;  %v1371_v46 = vsel %vm1370_vm1, 1, %v1983_v48 }
 0x5ba   :  { %1272 = vmatpush.msrb.mxu0 %v1851_v62  ;;  %1301 = vmatpush.msrb.mxu1 %v1866_v36  ;;  %v1372_v36 = vperm.slane %v1371_v46, 0 }
 0x5bb   :  { %v1880_v51 = vpop.permute.xlu0 %1879 }
 0x5bc   :  { %v1881_v54 = vunpack.i.l.bf16 %v1880_v51  ;;  %1273 = vmatpush.msrb.mxu0 %v1852_v8  ;;  %1302 = vmatpush.msrb.mxu1 %v1867_v0  ;;  %v1882_v57 = vunpack.i.h.bf16 %v1880_v51  ;;  %v1895_v6 = vpop.permute.xlu1 %1894  ;;  %vm1373_vm2 = vcmp.eq.s32.totalorder %v1372_v36, 1 }
 0x5bd   :  { %v1896_v9 = vunpack.i.l.bf16 %v1895_v6  ;;  %v1897_v20 = vunpack.i.h.bf16 %v1895_v6 }
 0x5be   :  { %1274 = vmatpush.msrb.mxu0 %v1881_v54  ;;  %1303 = vmatpush.msrb.mxu1 %v1891_v52 }
 0x5c0   :  { %1275 = vmatpush.msrb.mxu0 %v1882_v57  ;;  %1304 = vmatpush.msrb.mxu1 %v1892_v55 }
 0x5c2   :  { %1276 = vmatpush.msrb.mxu0 %v1871_v53 }
 0x5c3   :  { %v1885_v42 = vpop.permute.xlu0 %1884 }
 0x5c4   :  { %v1886_v60 = vunpack.i.l.bf16 %v1885_v42  ;;  %1277 = vmatpush.msrb.mxu0 %v1872_v35  ;;  %v1887_v13 = vunpack.i.h.bf16 %v1885_v42  ;;  %v1242_v30 = vpop.permute.xlu1 %1241 }
 0x5c6   :  { %1606 = vmatpush.msk.msrb.mxu0 %vm1141_vm0, %v2793_v27  ;;  %1305 = vmatpush.msrb.mxu1 %v1886_v60 }
 0x5c8   :  { %1607 = vmatpush.msk.msrb.mxu0 %vm1141_vm0, %v2796_v29  ;;  %1306 = vmatpush.msrb.mxu1 %v1887_v13 }
 0x5ca   :  { %1608 = vmatpush.msk.msrb.mxu0 %vm1141_vm0, %v2782_v21  ;;  %1307 = vmatpush.msrb.mxu1 %v1896_v9  ;;  %v1228_v21 = vld [vmem:[%s2954_s5 + $0x30] sm:$0xff] }
 0x5cb   :  { %v1237_v33 = vpop.permute.xlu0 %1236 }
 0x5cc   :  { %1609 = vmatpush.msk.msrb.mxu0 %vm1141_vm0, %v2785_v31  ;;  %1308 = vmatpush.msrb.mxu1 %v1897_v20  ;;  %v1229_v31 = vld [vmem:[%s2954_s5 + $0x38] sm:$0xff] }
 0x5cd   :  { %1282 = vmatmul.f32.vlgmr.msrb.gmra.mxu0 %v1222_v59 }
 0x5ce   :  { %1309 = vmatpush.msrb.mxu1 %v1901_v63  ;;  %v1481_v63 = vld [vmem:[%s2956_s8] sm:$0xff] }
 0x5d0   :  { %1310 = vmatpush.msrb.mxu1 %v1902_v16 }
 0x5d1   :  { %1610 = vmatmul.msk.f32.vlgmr.msrb.gmra.mxu1 %vm904_vm4, %v1223_v49 }
 0x5d2   :  { %1545 = vmatpush.msra.mxu1 %v1963_v4 }
 0x5d3   :  { %v1252_v23 = vpop.permute.xlu0 %1251 }
 0x5d4   :  { %1546 = vmatpush.msra.mxu1 %v1964_v61 }
 0x5d5   :  { %1285 = vmatmul.f32.gmra.mxu0 %v1224_v47 }
 0x5d6   :  { %1547 = vmatpush.msra.mxu1 %v1965_v10 }
 0x5d8   :  { %1548 = vmatpush.msra.mxu1 %v1966_v11 }
 0x5d9   :  { %1611 = vmatmul.msk.f32.gmra.mxu1 %vm904_vm4, %v1225_v2 }
 0x5da   :  { %1549 = vmatpush.msra.mxu1 %v1967_v15 }
 0x5dc   :  { %1550 = vmatpush.msra.mxu1 %v1968_v17 }
 0x5dd   :  { %1288 = vmatmul.f32.gmra.mxu0 %v1226_v28 }
 0x5e1   :  { %1612 = vmatmul.msk.f32.gmra.mxu1 %vm904_vm4, %v1227_v19 }
 0x5e5   :  { %1291 = vmatmul.f32.gmra.mxu0 %v1228_v21 }
 0x5e9   :  { %1613 = vmatmul.msk.f32.gmra.mxu1 %vm904_vm4, %v1229_v31 }
 0x64a   :  { %v1283_v58 = vpop.f32.mrf.mxu0 }
 0x64b   :  { %v1284_v24 = vadd.f32 %v1283_v58, %v1237_v33 }
 0x64e   :  { %v1312_v27 = vpop.f32.mrf.mxu1 }
 0x64f   :  { %v1313_v22 = vadd.f32 %v1312_v27, %v1284_v24 }
 0x651   :  { %v1324_v29 = vmax.f32 %v1313_v22, 0.0 }
 0x652   :  { %v1286_v37 = vpop.f32.mrf.mxu0 }
 0x653   :  { %1614 = vmatmul.msk.f32.vlgmr.msrb.gmra.mxu2 %vm904_vm4, %v1324_v29  ;;  %v1287_v14 = vadd.f32 %v1286_v37, %v1242_v30 }
 0x656   :  { %v1315_v32 = vpop.f32.mrf.mxu1 }
 0x657   :  { %v1316_v38 = vadd.f32 %v1315_v32, %v1287_v14 }
 0x659   :  { %v1325_v34 = vmax.f32 %v1316_v38, 0.0 }
 0x65a   :  { %v1289_v39 = vpop.f32.mrf.mxu0 }
 0x65b   :  { %1615 = vmatmul.msk.f32.gmra.mxu2 %vm904_vm4, %v1325_v34  ;;  %v1290_v18 = vadd.f32 %v1289_v39, %v1247_v40 }
 0x65e   :  { %v1318_v25 = vpop.f32.mrf.mxu1 }
 0x65f   :  { %v1319_v3 = vadd.f32 %v1318_v25, %v1290_v18 }
 0x661   :  { %v1326_v41 = vmax.f32 %v1319_v3, 0.0 }
 0x662   :  { %v1292_v7 = vpop.f32.mrf.mxu0 }
 0x663   :  { %1616 = vmatmul.msk.f32.gmra.mxu2 %vm904_vm4, %v1326_v41  ;;  %v1293_v12 = vadd.f32 %v1292_v7, %v1252_v23  ;;  %v1479_v41 = vld [vmem:[%s2957_s7] sm:$0xff] }
 0x666   :  { %v1321_v26 = vpop.f32.mrf.mxu1 }
 0x667   :  { %v1322_v43 = vadd.f32 %v1321_v26, %v1293_v12 }
 0x669   :  { %v1327_v1 = vmax.f32 %v1322_v43, 0.0 }
 0x66b   :  { %1617 = vmatmul.msk.f32.gmra.mxu2 %vm904_vm4, %v1327_v1  ;;  %v1480_v1 = vld [vmem:[%s2957_s7 + $0x8] sm:$0xff] }
 0x6d6   :  { %v1357_v45 = vpop.f32.mrf.mxu2 }
 0x6d7   :  { %v1374_v54 = vsel %vm1373_vm2, %v1357_v45, 0.0 }
 0x6de   :  { %v1360_v62 = vpop.f32.mrf.mxu2 }
 0x6df   :  { %v1375_v50 = vsel %vm1373_vm2, %v1360_v62, 0.0 }
 0x6e0   :  { %1384 = vrot.lane.b32.xlu0 %v1375_v50, %s1984_s2 }
 0x6e6   :  { %v1363_v0 = vpop.f32.mrf.mxu2 }
 0x6e7   :  { %v1376_v8 = vsel %vm1373_vm2, %v1363_v0, 0.0 }
 0x6e8   :  { %1386 = vrot.lane.b32.xlu2 %v1376_v8, %s1984_s2 }
 0x6ee   :  { %v1366_v51 = vpop.f32.mrf.mxu2 }
 0x6ef   :  { %v1377_v52 = vsel %vm1373_vm2, %v1366_v51, 0.0 }
 0x6f0   :  { %1388 = vrot.lane.b32.xlu1 %v1377_v52, %s1984_s2 }
 0x6f8   :  { %1382 = vrot.lane.b32.xlu1 %v1374_v54, %s1984_s2 }
 0x742   :  { %v1387_v56 = vpop.permute.xlu2 %1386 }
 0x743   :  { %v2892_v48 = vsel %vm674_vm12, 0.0, %v1387_v56 }
 0x744   :  { %v1401_v53 = vsel %vm1398_vm5, %v2892_v48, 0.0 }
 0x752   :  { %v1385_v60 = vpop.permute.xlu0 %1384 }
 0x753   :  { %v2904_v6 = vsel %vm674_vm12, 0.0, %v1385_v60 }
 0x754   :  { %v1400_v44 = vsel %vm1398_vm5, %v2904_v6, 0.0 }
 0x762   :  { %v1389_v55 = vpop.permute.xlu1 %1388 }
 0x763   :  { %v2895_v57 = vsel %vm674_vm12, 0.0, %v1389_v55 }
 0x764   :  { %v1402_v35 = vsel %vm1398_vm5, %v2895_v57, 0.0 }
 0x765   :  { %v1923_v42 = vpack.i.bf16 %v1401_v53, %v1402_v35 }
 0x767   :  { %1924 = vrot.lane.b32.xlu1 %v1923_v42, %s1973_s30  ;;  %1904 = vrot.lane.b32.xlu2 %v1923_v42, %s1975_s15 }
 0x76a   :  { %v1383_v13 = vpop.permute.xlu1 %1382 }
 0x76b   :  { %v2907_v9 = vsel %vm674_vm12, 0.0, %v1383_v13 }
 0x76c   :  { %v1399_v20 = vsel %vm1398_vm5, %v2907_v9, 0.0 }
 0x76d   :  { %v1913_v59 = vpack.i.bf16 %v1399_v20, %v1400_v44 }
 0x76f   :  { %1939 = vrot.lane.b32.xlu1 %v1923_v42, %s1981_s21  ;;  %1914 = vrot.lane.b32.xlu2 %v1913_v59, %s1973_s30 }
 0x770   :  { %1909 = vrot.lane.b32.xlu0 %v1913_v59, %s1975_s15 }
 0x777   :  { %1944 = vrot.lane.b32.xlu1 %v1923_v42, %s1979_s19  ;;  %1919 = vrot.lane.b32.xlu2 %v1913_v59, %s1972_s29 }
 0x778   :  { %1929 = vrot.lane.b32.xlu0 %v1923_v42, %s1972_s29 }
 0x77f   :  { %1959 = vrot.lane.b32.xlu1 %v1913_v59, %s1977_s17  ;;  %1949 = vrot.lane.b32.xlu2 %v1913_v59, %s1979_s19 }
 0x780   :  { %1934 = vrot.lane.b32.xlu0 %v1913_v59, %s1981_s21 }
 0x787   :  { %1484 = vperm.xlu2 %1722, %v1481_v63  }
 0x788   :  { %1954 = vrot.lane.b32.xlu0 %v1923_v42, %s1977_s17 }
 0x7c1   :  { %v1905_v16 = vpop.permute.xlu2 %1904 }
 0x7c2   :  { %v1906_v49 = vunpack.i.l.bf16 %v1905_v16  ;;  %v1907_v47 = vunpack.i.h.bf16 %v1905_v16 }
 0x7c4   :  { %1490 = vmatpush.msrb.mxu3 %v1906_v49 }
 0x7c6   :  { %1491 = vmatpush.msrb.mxu3 %v1907_v47 }
 0x7c9   :  { %v1915_v28 = vpop.permute.xlu2 %1914 }
 0x7ca   :  { %v1916_v58 = vunpack.i.l.bf16 %v1915_v28  ;;  %v1917_v33 = vunpack.i.h.bf16 %v1915_v28 }
 0x7d1   :  { %v1920_v24 = vpop.permute.xlu2 %1919 }
 0x7d2   :  { %v1921_v37 = vunpack.i.l.bf16 %v1920_v24  ;;  %v1922_v32 = vunpack.i.h.bf16 %v1920_v24 }
 0x7d9   :  { %v1925_v4 = vpop.permute.xlu1 %1924  ;;  %v1950_v39 = vpop.permute.xlu2 %1949 }
 0x7da   :  { %v1926_v19 = vunpack.i.l.bf16 %v1925_v4  ;;  %v1927_v21 = vunpack.i.h.bf16 %v1925_v4  ;;  %v1951_v18 = vunpack.i.l.bf16 %v1950_v39  ;;  %v1952_v3 = vunpack.i.h.bf16 %v1950_v39 }
 0x7e1   :  { %v1940_v61 = vpop.permute.xlu1 %1939  ;;  %v1485_v5 = vpop.permute.xlu2 %1484 }
 0x7e2   :  { %v1910_v2 = vpop.permute.xlu0 %1909  ;;  %v1941_v10 = vunpack.i.l.bf16 %v1940_v61  ;;  %v1942_v15 = vunpack.i.h.bf16 %v1940_v61 }
 0x7e3   :  { %v1911_v11 = vunpack.i.l.bf16 %v1910_v2  ;;  %v1912_v17 = vunpack.i.h.bf16 %v1910_v2 }
 0x7e4   :  { %1514 = vmatpush.msra.mxu0 %v1941_v10 }
 0x7e5   :  { %1492 = vmatpush.msrb.mxu3 %v1911_v11 }
 0x7e6   :  { %1515 = vmatpush.msra.mxu0 %v1942_v15 }
 0x7e7   :  { %1493 = vmatpush.msrb.mxu3 %v1912_v17 }
 0x7e9   :  { %1494 = vmatpush.msrb.mxu3 %v1926_v19  ;;  %v1945_v14 = vpop.permute.xlu1 %1944 }
 0x7ea   :  { %v1930_v31 = vpop.permute.xlu0 %1929  ;;  %v1946_v34 = vunpack.i.l.bf16 %v1945_v14  ;;  %v1947_v40 = vunpack.i.h.bf16 %v1945_v14 }
 0x7eb   :  { %1495 = vmatpush.msrb.mxu3 %v1927_v21  ;;  %v1931_v27 = vunpack.i.l.bf16 %v1930_v31  ;;  %v1932_v22 = vunpack.i.h.bf16 %v1930_v31 }
 0x7ed   :  { %1496 = vmatpush.msrb.mxu3 %v1916_v58 }
 0x7ef   :  { %1497 = vmatpush.msrb.mxu3 %v1917_v33 }
 0x7f1   :  { %1498 = vmatpush.msrb.mxu3 %v1931_v27  ;;  %v1960_v23 = vpop.permute.xlu1 %1959 }
 0x7f2   :  { %v1935_v29 = vpop.permute.xlu0 %1934  ;;  %v1961_v26 = vunpack.i.l.bf16 %v1960_v23  ;;  %v1962_v43 = vunpack.i.h.bf16 %v1960_v23 }
 0x7f3   :  { %v1936_v30 = vunpack.i.l.bf16 %v1935_v29  ;;  %1499 = vmatpush.msrb.mxu3 %v1932_v22  ;;  %v1937_v38 = vunpack.i.h.bf16 %v1935_v29 }
 0x7f5   :  { %1500 = vmatpush.msrb.mxu3 %v1921_v37  ;;  %1516 = vmatpush.msra.mxu0 %v1936_v30 }
 0x7f7   :  { %1501 = vmatpush.msrb.mxu3 %v1922_v32  ;;  %1517 = vmatpush.msra.mxu0 %v1937_v38 }
 0x7f9   :  { %1618 = vmatpush.msk.msrb.mxu3 %vm1398_vm5, %v2895_v57  ;;  %1518 = vmatpush.msra.mxu0 %v1946_v34 }
 0x7fa   :  { %v1955_v25 = vpop.permute.xlu0 %1954 }
 0x7fb   :  { %1619 = vmatpush.msk.msrb.mxu3 %vm1398_vm5, %v2892_v48  ;;  %1519 = vmatpush.msra.mxu0 %v1947_v40  ;;  %v1956_v7 = vunpack.i.l.bf16 %v1955_v25  ;;  %v1957_v12 = vunpack.i.h.bf16 %v1955_v25 }
 0x7fd   :  { %1620 = vmatpush.msk.msrb.mxu3 %vm1398_vm5, %v2904_v6  ;;  %1520 = vmatpush.msra.mxu0 %v1951_v18 }
 0x7ff   :  { %1621 = vmatpush.msk.msrb.mxu3 %vm1398_vm5, %v2907_v9  ;;  %1521 = vmatpush.msra.mxu0 %v1952_v3 }
 0x800   :  { %1506 = vmatmul.f32.vlgmr.msrb.gmra.mxu3 %v1479_v41 }
 0x801   :  { %1522 = vmatpush.msra.mxu0 %v1956_v7 }
 0x803   :  { %1523 = vmatpush.msra.mxu0 %v1957_v12 }
 0x805   :  { %1524 = vmatpush.msra.mxu0 %v1961_v26 }
 0x807   :  { %1525 = vmatpush.msra.mxu0 %v1962_v43 }
 0x808   :  { %1622 = vmatmul.msk.f32.vlgmr.msra.gmra.mxu0 %vm904_vm4, %v1480_v1 }
 0x883   :  { %v1507_v45 = vpop.f32.mrf.mxu3 }
 0x884   :  { %v1508_v46 = vadd.f32 %v1507_v45, %v1485_v5 }
 0x885   :  { %v1527_v36 = vpop.f32.mrf.mxu0 }
 0x886   :  { %v1528_v62 = vadd.f32 %v1527_v36, %v1508_v46 }
 0x888   :  { %v1530_v50 = vmax.f32 %v1528_v62, 0.0 }
 0x88a   :  { %1623 = vmatmul.msk.f32.vlgmr.msra.gmra.mxu1 %vm1531_vm6, %v1530_v50 }
 0x907   :  { %v1552_v0 = vpop.f32.mrf.mxu1 }
 0x908   :  { %1556 = vrot.lane.b32.xlu0 %v1552_v0, %s1977_s17 }
 0x97a   :  { %v1557_v8 = vpop.permute.xlu0 %1556 }
 0x97b   :  { %v1560_v51 = vsel %vm1559_vm7, %v1552_v0, %v1557_v8 }
 0x97c   :  { %1562 = vst.msk [vmem:[%s2958_s13] sm:$0xff] %vm1561_vm8, %v1560_v51 }

</bundles_post_ra>
